<compile_context>
chip_gen: v6e
topology: v6e:2x2x1
jax: 0.10.0
libtpu: 0.0.40
codegen_flags: <defaults>
</compile_context>

<pallas_src>
import math
import functools

import jax
import jax.numpy as jnp
from jax.experimental import pallas as pl
from jax.experimental.pallas import tpu as pltpu

LN_EPS = 1e-5                      # torch.nn.LayerNorm default
GELU_C = math.sqrt(2.0 / math.pi)  # NewGELU constant


def _layernorm(x, w, b):
    mu = jnp.mean(x, axis=-1, keepdims=True)
    xc = x - mu
    var = jnp.mean(xc * xc, axis=-1, keepdims=True)
    return xc * jax.lax.rsqrt(var + LN_EPS) * w + b


def _fused_kernel(x_ref, pos_ref, mask_ref, kvmask_ref,
                  ln1_w_ref, ln1_b_ref, wqkv_ref, bqkv_ref, wo_ref, bo_ref,
                  ln2_w_ref, ln2_b_ref, wfc_ref, bfc_ref, wproj_ref, bproj_ref,
                  lnf_w_ref, lnf_b_ref,
                  out_ref, h_ref, *, S, D, H):
    """One (batch element, layer) step of the TemporalAggregator forward.

    grid = (B, n_layer);  program_id(0)=batch (parallel), program_id(1)=layer.
    x_ref / pos_ref / out_ref : (S, D)      per-batch blocks
    mask_ref                  : (S, H*S)    additive causal mask (0 or -1e30), head-tiled
    kvmask_ref                : (H*S, D)    block-diagonal K/V packing mask
    per-layer weight refs     : current layer's slice (leading layer dim squeezed)
    h_ref                     : (S, D) VMEM scratch, carries activations across layers
    """
    Dh = D // H
    scale = 1.0 / math.sqrt(Dh)
    layer = pl.program_id(1)
    n_layers = pl.num_programs(1)

    # Positional-embedding add (dropout = identity in eval mode) once per batch elem.
    @pl.when(layer == 0)
    def _init():
        h_ref[...] = x_ref[...] + pos_ref[...]

    h = h_ref[...]                          # (S, D) f32 residual stream
    kvmask = kvmask_ref[...]                # (H*S, D)

    # ---------------- multi-head self attention ----------------
    hn = _layernorm(h, ln1_w_ref[...], ln1_b_ref[...])
    qkv = jnp.dot(hn, wqkv_ref[...],
                  preferred_element_type=jnp.float32) + bqkv_ref[...]   # (S, 3D)
    q = qkv[:, :D]                          # (S, D)
    k = qkv[:, D:2 * D]
    v = qkv[:, 2 * D:]

    # Block-diagonal packed K / V: head hh occupies rows hh*S..(hh+1)*S,
    # columns hh*Dh..(hh+1)*Dh.  (selection mask is precomputed on host)
    k_bd = jnp.concatenate([k] * H, axis=0) * kvmask    # (H*S, D)
    v_bd = jnp.concatenate([v] * H, axis=0) * kvmask    # (H*S, D)

    # Packed scores: column block hh == q_hh @ k_hh^T.  Lane-dense (S, H*S).
    # bf16 operands, f32 accumulation (numerically safe per review).
    s = jax.lax.dot_general(
        q.astype(jnp.bfloat16), k_bd.astype(jnp.bfloat16),
        (((1,), (1,)), ((), ())),
        preferred_element_type=jnp.float32) * scale + mask_ref[...]

    # Exact per-head softmax: per-head max & sum via static lane slices, so one
    # head's logits can never underflow another head's probabilities.
    p_parts = []
    for hh in range(H):
        sh = s[:, hh * S:(hh + 1) * S]                      # (S, S)
        mh = jnp.max(sh, axis=-1, keepdims=True)            # per-head max
        eh = jnp.exp(sh - mh)
        dh = jnp.sum(eh, axis=-1, keepdims=True)
        p_parts.append(eh * pl.reciprocal(dh, approx=False))
    p = jnp.concatenate(p_parts, axis=-1)                    # (S, H*S)

    # Packed p @ block-diag V lands each head's output in its own columns.
    attn = jnp.dot(p.astype(jnp.bfloat16), v_bd.astype(jnp.bfloat16),
                   preferred_element_type=jnp.float32)       # (S, D)
    attn = jnp.dot(attn, wo_ref[...],
                   preferred_element_type=jnp.float32) + bo_ref[...]
    h = h + attn

    # ---------------- MLP ----------------
    hn2 = _layernorm(h, ln2_w_ref[...], ln2_b_ref[...])
    u = jnp.dot(hn2, wfc_ref[...],
                preferred_element_type=jnp.float32) + bfc_ref[...]
    g = 0.5 * u * (1.0 + jnp.tanh(GELU_C * (u + 0.044715 * u * u * u)))
    h = h + jnp.dot(g, wproj_ref[...],
                    preferred_element_type=jnp.float32) + bproj_ref[...]

    h_ref[...] = h

    # Final LayerNorm + writeback only at the last layer (output block is
    # VMEM-resident across the layer axis).
    @pl.when(layer == n_layers - 1)
    def _finalize():
        out_ref[...] = _layernorm(h, lnf_w_ref[...], lnf_b_ref[...])


def fused_forward(x3, pos3, mask_add, kv_blockmask, layer_stacked, lnf_w, lnf_b,
                  *, B, S, D, num_heads, n_layer):
    kernel = functools.partial(_fused_kernel, S=S, D=D, H=num_heads)

    io_spec = pl.BlockSpec((None, S, D), lambda b, l: (b, 0, 0))

    def shared_spec(a):        # whole array, VMEM-resident (block index never changes)
        return pl.BlockSpec(a.shape, lambda b, l, nd=a.ndim: (0,) * nd)

    def layer_spec(a):         # per-layer slice, streamed along the layer grid axis
        return pl.BlockSpec((None,) + a.shape[1:],
                            lambda b, l, nd=a.ndim: (l,) + (0,) * (nd - 1))

    in_specs = ([io_spec, io_spec,
                 shared_spec(mask_add), shared_spec(kv_blockmask)]
                + [layer_spec(a) for a in layer_stacked]
                + [shared_spec(lnf_w), shared_spec(lnf_b)])

    grid_spec = pltpu.PrefetchScalarGridSpec(
        num_scalar_prefetch=0,
        grid=(B, n_layer),
        in_specs=in_specs,
        out_specs=pl.BlockSpec((None, S, D), lambda b, l: (b, 0, 0)),
        scratch_shapes=[pltpu.VMEM((S, D), jnp.float32)],   # residual stream carry
    )

    return pl.pallas_call(
        kernel,
        out_shape=jax.ShapeDtypeStruct((B, S, D), jnp.float32),
        grid_spec=grid_spec,
        compiler_params=pltpu.CompilerParams(
            # batch across TensorCores (v7x megacore); layer axis is a carried loop
            dimension_semantics=("parallel", "arbitrary"),
            vmem_limit_bytes=32 * 1024 * 1024,
        ),
    )(x3, pos3, mask_add, kv_blockmask, *layer_stacked, lnf_w, lnf_b)


# ------------------------- model glue (plain JAX) -------------------------

def make_mask(block_size, group_size):
    """1 - tril, repeat_interleave by group_size along both axes (1.0 = blocked)."""
    m = 1.0 - jnp.tril(jnp.ones((block_size, block_size), jnp.float32))
    m = jnp.repeat(m, group_size, axis=1)
    m = jnp.repeat(m, group_size, axis=0)
    return m


def init_params(key, n_layer, n_embd, vocab=50):
    std = 0.02
    proj_std = 0.02 / math.sqrt(2 * n_layer)
    keys = jax.random.split(key, 1 + n_layer)
    params = {
        "wpe": (std * jax.random.normal(keys[0], (vocab, n_embd))).astype(jnp.float32),
        "lnf_w": jnp.ones((1, n_embd), jnp.float32),
        "lnf_b": jnp.zeros((1, n_embd), jnp.float32),
        "blocks": [],
    }
    D, F = n_embd, 4 * n_embd
    for li in range(n_layer):
        ks = jax.random.split(keys[1 + li], 6)
        blk = dict(
            ln1_w=jnp.ones((1, D)), ln1_b=jnp.zeros((1, D)),
            wq=std * jax.random.normal(ks[0], (D, D)), bq=jnp.zeros((1, D)),
            wk=std * jax.random.normal(ks[1], (D, D)), bk=jnp.zeros((1, D)),
            wv=std * jax.random.normal(ks[2], (D, D)), bv=jnp.zeros((1, D)),
            wo=std * jax.random.normal(ks[3], (D, D)), bo=jnp.zeros((1, D)),
            ln2_w=jnp.ones((1, D)), ln2_b=jnp.zeros((1, D)),
            wfc=std * jax.random.normal(ks[4], (D, F)), bfc=jnp.zeros((1, F)),
            wproj=proj_std * jax.random.normal(ks[5], (F, D)), bproj=jnp.zeros((1, D)),
        )
        params["blocks"].append({k: v.astype(jnp.float32) for k, v in blk.items()})
    return params


def temporal_aggregator_forward(x, study_date, params, mask, num_heads):
    B, T, G, D = x.shape
    S = T * G
    H = num_heads
    Dh = D // H
    blocks = params["blocks"]
    L = len(blocks)

    # Embedding gather + group repeat stay in plain JAX (no clean Pallas gather here).
    sd = jnp.clip(study_date.astype(jnp.int32), 0, 49)
    pos = params["wpe"][sd]                                          # (B, T, D)
    pos = jnp.broadcast_to(pos[:, :, None, :], (B, T, G, D)).reshape(B, S, D)
    x3 = x.reshape(B, S, D)

    # Hoisted constants (review): additive causal mask tiled across heads along lanes,
    # and the block-diagonal K/V packing mask.
    mask_add = jnp.tile(mask * jnp.float32(-1e30), (1, H))           # (S, H*S)
    r = jnp.arange(H * S)[:, None]
    c = jnp.arange(D)[None, :]
    kv_blockmask = ((r // S) == (c // Dh)).astype(jnp.float32)       # (H*S, D)

    def stack(key):
        return jnp.stack([blk[key] for blk in blocks], axis=0)

    wqkv = jnp.stack(
        [jnp.concatenate([blk["wq"], blk["wk"], blk["wv"]], axis=1) for blk in blocks], 0)
    bqkv = jnp.stack(
        [jnp.concatenate([blk["bq"], blk["bk"], blk["bv"]], axis=1) for blk in blocks], 0)

    layer_stacked = [stack("ln1_w"), stack("ln1_b"), wqkv, bqkv,
                     stack("wo"), stack("bo"),
                     stack("ln2_w"), stack("ln2_b"),
                     stack("wfc"), stack("bfc"), stack("wproj"), stack("bproj")]

    out = fused_forward(x3, pos, mask_add, kv_blockmask, layer_stacked,
                        params["lnf_w"], params["lnf_b"],
                        B=B, S=S, D=D, num_heads=H, n_layer=L)
    return out                                                        # (B, S, D)


# ------------------------- pure-JAX reference -------------------------

def _ref_ln(x, w, b):
    mu = x.mean(-1, keepdims=True)
    var = ((x - mu) ** 2).mean(-1, keepdims=True)
    return (x - mu) / jnp.sqrt(var + LN_EPS) * w + b


def _ref_block(x, mask, p, num_heads):
    B, S, D = x.shape
    Dh = D // num_heads
    h = _ref_ln(x, p["ln1_w"], p["ln1_b"])
    q = h @ p["wq"] + p["bq"]
    k = h @ p["wk"] + p["bk"]
    v = h @ p["wv"] + p["bv"]
    q = q.reshape(B, S, num_heads, Dh).transpose(0, 2, 1, 3)
    k = k.reshape(B, S, num_heads, Dh).transpose(0, 2, 1, 3)
    v = v.reshape(B, S, num_heads, Dh).transpose(0, 2, 1, 3)
    s = jnp.einsum("bhqd,bhkd->bhqk", q, k) / math.sqrt(Dh)
    s = jnp.where(mask[None, None] != 0.0, -1e30, s)
    pr = jax.nn.softmax(s, axis=-1)
    o = jnp.einsum("bhqk,bhkd->bhqd", pr, v)
    o = o.transpose(0, 2, 1, 3).reshape(B, S, D)
    x = x + (o @ p["wo"] + p["bo"])
    h2 = _ref_ln(x, p["ln2_w"], p["ln2_b"])
    u = h2 @ p["wfc"] + p["bfc"]
    g = 0.5 * u * (1.0 + jnp.tanh(GELU_C * (u + 0.044715 * u ** 3)))
    return x + (g @ p["wproj"] + p["bproj"])


def reference_forward(x, study_date, params, mask, num_heads):
    with jax.default_matmul_precision("highest"):
        B, T, G, D = x.shape
        sd = jnp.clip(study_date.astype(jnp.int32), 0, 49)
        pos = params["wpe"][sd]
        pos = jnp.broadcast_to(pos[:, :, None, :], (B, T, G, D))
        h = (x + pos).reshape(B, T * G, D)
        for blk in params["blocks"]:
            h = _ref_block(h, mask, blk, num_heads)
        return _ref_ln(h, params["lnf_w"], params["lnf_b"])


if __name__ == "__main__":
    group_size = 4    # p
    block_size = 8    # t
    n_embd = 32
    num_heads = 4
    n_layer = 2
    B = 2

    key = jax.random.PRNGKey(0)
    kx, kd, kp = jax.random.split(key, 3)
    x = jax.random.normal(kx, (B, block_size, group_size, n_embd), jnp.float32)
    study_date = jax.random.randint(kd, (B, block_size), 0, 60)   # exercises clamp to [0,49]
    params = init_params(kp, n_layer, n_embd)
    mask = make_mask(block_size, group_size)

    out = temporal_aggregator_forward(x, study_date, params, mask, num_heads)
    out = jax.block_until_ready(out)

    ref = reference_forward(x, study_date, params, mask, num_heads)
    assert out.shape == (B, block_size * group_size, n_embd)
    assert bool(jnp.all(jnp.isfinite(out)))
    max_err = float(jnp.max(jnp.abs(out - ref)))
    assert bool(jnp.allclose(out, ref, rtol=2e-3, atol=2e-3)), f"max_err={max_err}"

    print("KERNEL_OK")
</pallas_src>

<mosaic_0001>
module attributes {stable_mosaic.version = 11 : i64} {
  func.func @_fused_kernel(%arg0: i32, %arg1: i32, %arg2: memref<1x32x32xf32, #tpu.memory_space<vmem>>, %arg3: memref<1x32x32xf32, #tpu.memory_space<vmem>>, %arg4: memref<32x128xf32, #tpu.memory_space<vmem>>, %arg5: memref<128x32xf32, #tpu.memory_space<vmem>>, %arg6: memref<1x1x32xf32, #tpu.memory_space<vmem>>, %arg7: memref<1x1x32xf32, #tpu.memory_space<vmem>>, %arg8: memref<1x32x96xf32, #tpu.memory_space<vmem>>, %arg9: memref<1x1x96xf32, #tpu.memory_space<vmem>>, %arg10: memref<1x32x32xf32, #tpu.memory_space<vmem>>, %arg11: memref<1x1x32xf32, #tpu.memory_space<vmem>>, %arg12: memref<1x1x32xf32, #tpu.memory_space<vmem>>, %arg13: memref<1x1x32xf32, #tpu.memory_space<vmem>>, %arg14: memref<1x32x128xf32, #tpu.memory_space<vmem>>, %arg15: memref<1x1x128xf32, #tpu.memory_space<vmem>>, %arg16: memref<1x128x32xf32, #tpu.memory_space<vmem>>, %arg17: memref<1x1x32xf32, #tpu.memory_space<vmem>>, %arg18: memref<1x32xf32, #tpu.memory_space<vmem>>, %arg19: memref<1x32xf32, #tpu.memory_space<vmem>>, %arg20: memref<1x32x32xf32, #tpu.memory_space<vmem>>, %arg21: memref<32x32xf32, #tpu.memory_space<vmem>>) attributes {dimension_semantics = [#tpu.dimension_semantics<parallel>, #tpu.dimension_semantics<arbitrary>], iteration_bounds = array<i64: 2, 2>, scalar_prefetch = 0 : i64, scratch_operands = 1 : i64, tpu.core_type = #tpu.core_type<tc>, window_params = [{transform_indices = @transform_0, window_bounds = array<i64: 1, 32, 32>}, {transform_indices = @transform_1, window_bounds = array<i64: 1, 32, 32>}, {pipeline_mode = #tpu.pipeline_mode<synchronous>, transform_indices = @transform_2, window_bounds = array<i64: 32, 128>}, {pipeline_mode = #tpu.pipeline_mode<synchronous>, transform_indices = @transform_3, window_bounds = array<i64: 128, 32>}, {transform_indices = @transform_4, window_bounds = array<i64: 1, 1, 32>}, {transform_indices = @transform_5, window_bounds = array<i64: 1, 1, 32>}, {transform_indices = @transform_6, window_bounds = array<i64: 1, 32, 96>}, {transform_indices = @transform_7, window_bounds = array<i64: 1, 1, 96>}, {transform_indices = @transform_8, window_bounds = array<i64: 1, 32, 32>}, {transform_indices = @transform_9, window_bounds = array<i64: 1, 1, 32>}, {transform_indices = @transform_10, window_bounds = array<i64: 1, 1, 32>}, {transform_indices = @transform_11, window_bounds = array<i64: 1, 1, 32>}, {transform_indices = @transform_12, window_bounds = array<i64: 1, 32, 128>}, {transform_indices = @transform_13, window_bounds = array<i64: 1, 1, 128>}, {transform_indices = @transform_14, window_bounds = array<i64: 1, 128, 32>}, {transform_indices = @transform_15, window_bounds = array<i64: 1, 1, 32>}, {pipeline_mode = #tpu.pipeline_mode<synchronous>, transform_indices = @transform_16, window_bounds = array<i64: 1, 32>}, {pipeline_mode = #tpu.pipeline_mode<synchronous>, transform_indices = @transform_17, window_bounds = array<i64: 1, 32>}, {transform_indices = @transform_18, window_bounds = array<i64: 1, 32, 32>}]} {
    %c0_i32 = arith.constant 0 : i32
    %0 = arith.cmpi eq, %arg1, %c0_i32 : i32
    %1 = arith.extui %0 : i1 to i32
    %c0_i32_0 = arith.constant 0 : i32
    %2 = arith.cmpi ne, %1, %c0_i32_0 : i32
    scf.if %2 {
      %c0_73 = arith.constant 0 : index
      %c0_74 = arith.constant 0 : index
      %c0_75 = arith.constant 0 : index
      %162 = vector.load %arg2[%c0_73, %c0_74, %c0_75] : memref<1x32x32xf32, #tpu.memory_space<vmem>>, vector<1x32x32xf32>
      %163 = vector.shape_cast %162 : vector<1x32x32xf32> to vector<32x32xf32>
      %c0_76 = arith.constant 0 : index
      %c0_77 = arith.constant 0 : index
      %c0_78 = arith.constant 0 : index
      %164 = vector.load %arg3[%c0_76, %c0_77, %c0_78] : memref<1x32x32xf32, #tpu.memory_space<vmem>>, vector<1x32x32xf32>
      %165 = vector.shape_cast %164 : vector<1x32x32xf32> to vector<32x32xf32>
      %166 = arith.addf %163, %165 : vector<32x32xf32>
      %c0_79 = arith.constant 0 : index
      %c0_80 = arith.constant 0 : index
      %167 = vector.load %arg21[%c0_79, %c0_80] : memref<32x32xf32, #tpu.memory_space<vmem>>, vector<32x32xf32>
      tpu.vector_store %arg21[%c0_79, %c0_80], %166 {strides = array<i32>} : memref<32x32xf32, #tpu.memory_space<vmem>>, vector<32x32xf32>,
    } else {
    }
    %c0 = arith.constant 0 : index
    %c0_1 = arith.constant 0 : index
    %3 = vector.load %arg21[%c0, %c0_1] : memref<32x32xf32, #tpu.memory_space<vmem>>, vector<32x32xf32>
    %c0_2 = arith.constant 0 : index
    %c0_3 = arith.constant 0 : index
    %4 = vector.load %arg5[%c0_2, %c0_3] : memref<128x32xf32, #tpu.memory_space<vmem>>, vector<128x32xf32>
    %c0_4 = arith.constant 0 : index
    %c0_5 = arith.constant 0 : index
    %c0_6 = arith.constant 0 : index
    %5 = vector.load %arg6[%c0_4, %c0_5, %c0_6] : memref<1x1x32xf32, #tpu.memory_space<vmem>>, vector<1x1x32xf32>
    %6 = vector.shape_cast %5 : vector<1x1x32xf32> to vector<1x32xf32>
    %c0_7 = arith.constant 0 : index
    %c0_8 = arith.constant 0 : index
    %c0_9 = arith.constant 0 : index
    %7 = vector.load %arg7[%c0_7, %c0_8, %c0_9] : memref<1x1x32xf32, #tpu.memory_space<vmem>>, vector<1x1x32xf32>
    %8 = vector.shape_cast %7 : vector<1x1x32xf32> to vector<1x32xf32>
    %cst = arith.constant dense<0.000000e+00> : vector<32xf32>
    %9 = vector.multi_reduction <add>, %3, %cst [1] : vector<32x32xf32> to vector<32xf32>
    %10 = vector.shape_cast %9 : vector<32xf32> to vector<32x1xf32>
    %cst_10 = arith.constant 3.200000e+01 : f32
    %11 = vector.broadcast %cst_10 : f32 to vector<32x1xf32>
    %12 = arith.divf %10, %11 : vector<32x1xf32>
    %13 = vector.broadcast %12 : vector<32x1xf32> to vector<32x32xf32>
    %14 = arith.subf %3, %13 : vector<32x32xf32>
    %15 = arith.mulf %14, %14 : vector<32x32xf32>
    %cst_11 = arith.constant dense<0.000000e+00> : vector<32xf32>
    %16 = vector.multi_reduction <add>, %15, %cst_11 [1] : vector<32x32xf32> to vector<32xf32>
    %17 = vector.shape_cast %16 : vector<32xf32> to vector<32x1xf32>
    %cst_12 = arith.constant 3.200000e+01 : f32
    %18 = vector.broadcast %cst_12 : f32 to vector<32x1xf32>
    %19 = arith.divf %17, %18 : vector<32x1xf32>
    %cst_13 = arith.constant 9.99999974E-6 : f32
    %20 = vector.broadcast %cst_13 : f32 to vector<32x1xf32>
    %21 = arith.addf %19, %20 : vector<32x1xf32>
    %22 = math.rsqrt %21 : vector<32x1xf32>
    %23 = vector.broadcast %22 : vector<32x1xf32> to vector<32x32xf32>
    %24 = arith.mulf %14, %23 : vector<32x32xf32>
    %25 = vector.broadcast %6 : vector<1x32xf32> to vector<32x32xf32>
    %26 = arith.mulf %24, %25 : vector<32x32xf32>
    %27 = vector.broadcast %8 : vector<1x32xf32> to vector<32x32xf32>
    %28 = arith.addf %26, %27 : vector<32x32xf32>
    %c0_14 = arith.constant 0 : index
    %c0_15 = arith.constant 0 : index
    %c0_16 = arith.constant 0 : index
    %29 = vector.load %arg8[%c0_14, %c0_15, %c0_16] : memref<1x32x96xf32, #tpu.memory_space<vmem>>, vector<1x32x96xf32>
    %30 = vector.shape_cast %29 : vector<1x32x96xf32> to vector<32x96xf32>
    %cst_17 = arith.constant dense<0.000000e+00> : vector<32x96xf32>
    %31 = tpu.matmul %28, %30, %cst_17 {dimension_numbers = #tpu.dot_dimension_numbers<[1], [0], [0], [1], [0, 0, 1, 1], [], []>} : vector<32x32xf32>, vector<32x96xf32>, vector<32x96xf32> -> vector<32x96xf32>
    %c0_18 = arith.constant 0 : index
    %c0_19 = arith.constant 0 : index
    %c0_20 = arith.constant 0 : index
    %32 = vector.load %arg9[%c0_18, %c0_19, %c0_20] : memref<1x1x96xf32, #tpu.memory_space<vmem>>, vector<1x1x96xf32>
    %33 = vector.shape_cast %32 : vector<1x1x96xf32> to vector<1x96xf32>
    %34 = vector.broadcast %33 : vector<1x96xf32> to vector<32x96xf32>
    %35 = arith.addf %31, %34 : vector<32x96xf32>
    %36 = vector.extract_strided_slice %35 {offsets = [0, 0], sizes = [32, 32], strides = [1, 1]} : vector<32x96xf32> to vector<32x32xf32>
    %37 = vector.extract_strided_slice %35 {offsets = [0, 32], sizes = [32, 32], strides = [1, 1]} : vector<32x96xf32> to vector<32x32xf32>
    %38 = vector.extract_strided_slice %35 {offsets = [0, 64], sizes = [32, 32], strides = [1, 1]} : vector<32x96xf32> to vector<32x32xf32>
    %39 = tpu.concatenate %37, %37, %37, %37 in 0 : vector<32x32xf32>, vector<32x32xf32>, vector<32x32xf32>, vector<32x32xf32> -> vector<128x32xf32>
    %40 = arith.mulf %39, %4 : vector<128x32xf32>
    %41 = tpu.concatenate %38, %38, %38, %38 in 0 : vector<32x32xf32>, vector<32x32xf32>, vector<32x32xf32>, vector<32x32xf32> -> vector<128x32xf32>
    %42 = arith.mulf %41, %4 : vector<128x32xf32>
    %43 = arith.truncf %36 : vector<32x32xf32> to vector<32x32xbf16>
    %44 = arith.truncf %40 : vector<128x32xf32> to vector<128x32xbf16>
    %cst_21 = arith.constant dense<0.000000e+00> : vector<32x128xf32>
    %45 = tpu.matmul %43, %44, %cst_21 {dimension_numbers = #tpu.dot_dimension_numbers<[1], [1], [0], [0], [0, 0, 1, 0], [], []>} : vector<32x32xbf16>, vector<128x32xbf16>, vector<32x128xf32> -> vector<32x128xf32>
    %cst_22 = arith.constant 0.353553385 : f32
    %46 = vector.broadcast %cst_22 : f32 to vector<32x128xf32>
    %47 = arith.mulf %45, %46 : vector<32x128xf32>
    %c0_23 = arith.constant 0 : index
    %c0_24 = arith.constant 0 : index
    %48 = vector.load %arg4[%c0_23, %c0_24] : memref<32x128xf32, #tpu.memory_space<vmem>>, vector<32x128xf32>
    %49 = arith.addf %47, %48 : vector<32x128xf32>
    %50 = vector.extract_strided_slice %49 {offsets = [0, 0], sizes = [32, 32], strides = [1, 1]} : vector<32x128xf32> to vector<32x32xf32>
    %cst_25 = arith.constant dense<0xFF800000> : vector<32xf32>
    %51 = vector.multi_reduction <maximumf>, %50, %cst_25 [1] : vector<32x32xf32> to vector<32xf32>
    %52 = vector.shape_cast %51 : vector<32xf32> to vector<32x1xf32>
    %53 = vector.broadcast %52 : vector<32x1xf32> to vector<32x32xf32>
    %54 = arith.subf %50, %53 : vector<32x32xf32>
    %55 = math.exp %54 : vector<32x32xf32>
    %cst_26 = arith.constant dense<0.000000e+00> : vector<32xf32>
    %56 = vector.multi_reduction <add>, %55, %cst_26 [1] : vector<32x32xf32> to vector<32xf32>
    %57 = vector.shape_cast %56 : vector<32xf32> to vector<32x1xf32>
    %58 = tpu.reciprocal %57 : vector<32x1xf32> -> vector<32x1xf32>
    %59 = vector.broadcast %58 : vector<32x1xf32> to vector<32x32xf32>
    %60 = arith.mulf %55, %59 : vector<32x32xf32>
    %61 = vector.extract_strided_slice %49 {offsets = [0, 32], sizes = [32, 32], strides = [1, 1]} : vector<32x128xf32> to vector<32x32xf32>
    %cst_27 = arith.constant dense<0xFF800000> : vector<32xf32>
    %62 = vector.multi_reduction <maximumf>, %61, %cst_27 [1] : vector<32x32xf32> to vector<32xf32>
    %63 = vector.shape_cast %62 : vector<32xf32> to vector<32x1xf32>
    %64 = vector.broadcast %63 : vector<32x1xf32> to vector<32x32xf32>
    %65 = arith.subf %61, %64 : vector<32x32xf32>
    %66 = math.exp %65 : vector<32x32xf32>
    %cst_28 = arith.constant dense<0.000000e+00> : vector<32xf32>
    %67 = vector.multi_reduction <add>, %66, %cst_28 [1] : vector<32x32xf32> to vector<32xf32>
    %68 = vector.shape_cast %67 : vector<32xf32> to vector<32x1xf32>
    %69 = tpu.reciprocal %68 : vector<32x1xf32> -> vector<32x1xf32>
    %70 = vector.broadcast %69 : vector<32x1xf32> to vector<32x32xf32>
    %71 = arith.mulf %66, %70 : vector<32x32xf32>
    %72 = vector.extract_strided_slice %49 {offsets = [0, 64], sizes = [32, 32], strides = [1, 1]} : vector<32x128xf32> to vector<32x32xf32>
    %cst_29 = arith.constant dense<0xFF800000> : vector<32xf32>
    %73 = vector.multi_reduction <maximumf>, %72, %cst_29 [1] : vector<32x32xf32> to vector<32xf32>
    %74 = vector.shape_cast %73 : vector<32xf32> to vector<32x1xf32>
    %75 = vector.broadcast %74 : vector<32x1xf32> to vector<32x32xf32>
    %76 = arith.subf %72, %75 : vector<32x32xf32>
    %77 = math.exp %76 : vector<32x32xf32>
    %cst_30 = arith.constant dense<0.000000e+00> : vector<32xf32>
    %78 = vector.multi_reduction <add>, %77, %cst_30 [1] : vector<32x32xf32> to vector<32xf32>
    %79 = vector.shape_cast %78 : vector<32xf32> to vector<32x1xf32>
    %80 = tpu.reciprocal %79 : vector<32x1xf32> -> vector<32x1xf32>
    %81 = vector.broadcast %80 : vector<32x1xf32> to vector<32x32xf32>
    %82 = arith.mulf %77, %81 : vector<32x32xf32>
    %83 = vector.extract_strided_slice %49 {offsets = [0, 96], sizes = [32, 32], strides = [1, 1]} : vector<32x128xf32> to vector<32x32xf32>
    %cst_31 = arith.constant dense<0xFF800000> : vector<32xf32>
    %84 = vector.multi_reduction <maximumf>, %83, %cst_31 [1] : vector<32x32xf32> to vector<32xf32>
    %85 = vector.shape_cast %84 : vector<32xf32> to vector<32x1xf32>
    %86 = vector.broadcast %85 : vector<32x1xf32> to vector<32x32xf32>
    %87 = arith.subf %83, %86 : vector<32x32xf32>
    %88 = math.exp %87 : vector<32x32xf32>
    %cst_32 = arith.constant dense<0.000000e+00> : vector<32xf32>
    %89 = vector.multi_reduction <add>, %88, %cst_32 [1] : vector<32x32xf32> to vector<32xf32>
    %90 = vector.shape_cast %89 : vector<32xf32> to vector<32x1xf32>
    %91 = tpu.reciprocal %90 : vector<32x1xf32> -> vector<32x1xf32>
    %92 = vector.broadcast %91 : vector<32x1xf32> to vector<32x32xf32>
    %93 = arith.mulf %88, %92 : vector<32x32xf32>
    %94 = tpu.concatenate %60, %71, %82, %93 in 1 : vector<32x32xf32>, vector<32x32xf32>, vector<32x32xf32>, vector<32x32xf32> -> vector<32x128xf32>
    %95 = arith.truncf %94 : vector<32x128xf32> to vector<32x128xbf16>
    %96 = arith.truncf %42 : vector<128x32xf32> to vector<128x32xbf16>
    %cst_33 = arith.constant dense<0.000000e+00> : vector<32x32xf32>
    %97 = tpu.matmul %95, %96, %cst_33 {dimension_numbers = #tpu.dot_dimension_numbers<[1], [0], [0], [1], [0, 0, 1, 1], [], []>} : vector<32x128xbf16>, vector<128x32xbf16>, vector<32x32xf32> -> vector<32x32xf32>
    %c0_34 = arith.constant 0 : index
    %c0_35 = arith.constant 0 : index
    %c0_36 = arith.constant 0 : index
    %98 = vector.load %arg10[%c0_34, %c0_35, %c0_36] : memref<1x32x32xf32, #tpu.memory_space<vmem>>, vector<1x32x32xf32>
    %99 = vector.shape_cast %98 : vector<1x32x32xf32> to vector<32x32xf32>
    %cst_37 = arith.constant dense<0.000000e+00> : vector<32x32xf32>
    %100 = tpu.matmul %97, %99, %cst_37 {dimension_numbers = #tpu.dot_dimension_numbers<[1], [0], [0], [1], [0, 0, 1, 1], [], []>} : vector<32x32xf32>, vector<32x32xf32>, vector<32x32xf32> -> vector<32x32xf32>
    %c0_38 = arith.constant 0 : index
    %c0_39 = arith.constant 0 : index
    %c0_40 = arith.constant 0 : index
    %101 = vector.load %arg11[%c0_38, %c0_39, %c0_40] : memref<1x1x32xf32, #tpu.memory_space<vmem>>, vector<1x1x32xf32>
    %102 = vector.shape_cast %101 : vector<1x1x32xf32> to vector<1x32xf32>
    %103 = vector.broadcast %102 : vector<1x32xf32> to vector<32x32xf32>
    %104 = arith.addf %100, %103 : vector<32x32xf32>
    %105 = arith.addf %3, %104 : vector<32x32xf32>
    %c0_41 = arith.constant 0 : index
    %c0_42 = arith.constant 0 : index
    %c0_43 = arith.constant 0 : index
    %106 = vector.load %arg12[%c0_41, %c0_42, %c0_43] : memref<1x1x32xf32, #tpu.memory_space<vmem>>, vector<1x1x32xf32>
    %107 = vector.shape_cast %106 : vector<1x1x32xf32> to vector<1x32xf32>
    %c0_44 = arith.constant 0 : index
    %c0_45 = arith.constant 0 : index
    %c0_46 = arith.constant 0 : index
    %108 = vector.load %arg13[%c0_44, %c0_45, %c0_46] : memref<1x1x32xf32, #tpu.memory_space<vmem>>, vector<1x1x32xf32>
    %109 = vector.shape_cast %108 : vector<1x1x32xf32> to vector<1x32xf32>
    %cst_47 = arith.constant dense<0.000000e+00> : vector<32xf32>
    %110 = vector.multi_reduction <add>, %105, %cst_47 [1] : vector<32x32xf32> to vector<32xf32>
    %111 = vector.shape_cast %110 : vector<32xf32> to vector<32x1xf32>
    %cst_48 = arith.constant 3.200000e+01 : f32
    %112 = vector.broadcast %cst_48 : f32 to vector<32x1xf32>
    %113 = arith.divf %111, %112 : vector<32x1xf32>
    %114 = vector.broadcast %113 : vector<32x1xf32> to vector<32x32xf32>
    %115 = arith.subf %105, %114 : vector<32x32xf32>
    %116 = arith.mulf %115, %115 : vector<32x32xf32>
    %cst_49 = arith.constant dense<0.000000e+00> : vector<32xf32>
    %117 = vector.multi_reduction <add>, %116, %cst_49 [1] : vector<32x32xf32> to vector<32xf32>
    %118 = vector.shape_cast %117 : vector<32xf32> to vector<32x1xf32>
    %cst_50 = arith.constant 3.200000e+01 : f32
    %119 = vector.broadcast %cst_50 : f32 to vector<32x1xf32>
    %120 = arith.divf %118, %119 : vector<32x1xf32>
    %cst_51 = arith.constant 9.99999974E-6 : f32
    %121 = vector.broadcast %cst_51 : f32 to vector<32x1xf32>
    %122 = arith.addf %120, %121 : vector<32x1xf32>
    %123 = math.rsqrt %122 : vector<32x1xf32>
    %124 = vector.broadcast %123 : vector<32x1xf32> to vector<32x32xf32>
    %125 = arith.mulf %115, %124 : vector<32x32xf32>
    %126 = vector.broadcast %107 : vector<1x32xf32> to vector<32x32xf32>
    %127 = arith.mulf %125, %126 : vector<32x32xf32>
    %128 = vector.broadcast %109 : vector<1x32xf32> to vector<32x32xf32>
    %129 = arith.addf %127, %128 : vector<32x32xf32>
    %c0_52 = arith.constant 0 : index
    %c0_53 = arith.constant 0 : index
    %c0_54 = arith.constant 0 : index
    %130 = vector.load %arg14[%c0_52, %c0_53, %c0_54] : memref<1x32x128xf32, #tpu.memory_space<vmem>>, vector<1x32x128xf32>
    %131 = vector.shape_cast %130 : vector<1x32x128xf32> to vector<32x128xf32>
    %cst_55 = arith.constant dense<0.000000e+00> : vector<32x128xf32>
    %132 = tpu.matmul %129, %131, %cst_55 {dimension_numbers = #tpu.dot_dimension_numbers<[1], [0], [0], [1], [0, 0, 1, 1], [], []>} : vector<32x32xf32>, vector<32x128xf32>, vector<32x128xf32> -> vector<32x128xf32>
    %c0_56 = arith.constant 0 : index
    %c0_57 = arith.constant 0 : index
    %c0_58 = arith.constant 0 : index
    %133 = vector.load %arg15[%c0_56, %c0_57, %c0_58] : memref<1x1x128xf32, #tpu.memory_space<vmem>>, vector<1x1x128xf32>
    %134 = vector.shape_cast %133 : vector<1x1x128xf32> to vector<1x128xf32>
    %135 = vector.broadcast %134 : vector<1x128xf32> to vector<32x128xf32>
    %136 = arith.addf %132, %135 : vector<32x128xf32>
    %cst_59 = arith.constant 5.000000e-01 : f32
    %137 = vector.broadcast %cst_59 : f32 to vector<32x128xf32>
    %138 = arith.mulf %137, %136 : vector<32x128xf32>
    %cst_60 = arith.constant 4.471500e-02 : f32
    %139 = vector.broadcast %cst_60 : f32 to vector<32x128xf32>
    %140 = arith.mulf %139, %136 : vector<32x128xf32>
    %141 = arith.mulf %140, %136 : vector<32x128xf32>
    %142 = arith.mulf %141, %136 : vector<32x128xf32>
    %143 = arith.addf %136, %142 : vector<32x128xf32>
    %cst_61 = arith.constant 0.797884583 : f32
    %144 = vector.broadcast %cst_61 : f32 to vector<32x128xf32>
    %145 = arith.mulf %144, %143 : vector<32x128xf32>
    %146 = math.tanh %145 : vector<32x128xf32>
    %cst_62 = arith.constant 1.000000e+00 : f32
    %147 = vector.broadcast %cst_62 : f32 to vector<32x128xf32>
    %148 = arith.addf %147, %146 : vector<32x128xf32>
    %149 = arith.mulf %138, %148 : vector<32x128xf32>
    %c0_63 = arith.constant 0 : index
    %c0_64 = arith.constant 0 : index
    %c0_65 = arith.constant 0 : index
    %150 = vector.load %arg16[%c0_63, %c0_64, %c0_65] : memref<1x128x32xf32, #tpu.memory_space<vmem>>, vector<1x128x32xf32>
    %151 = vector.shape_cast %150 : vector<1x128x32xf32> to vector<128x32xf32>
    %cst_66 = arith.constant dense<0.000000e+00> : vector<32x32xf32>
    %152 = tpu.matmul %149, %151, %cst_66 {dimension_numbers = #tpu.dot_dimension_numbers<[1], [0], [0], [1], [0, 0, 1, 1], [], []>} : vector<32x128xf32>, vector<128x32xf32>, vector<32x32xf32> -> vector<32x32xf32>
    %153 = arith.addf %105, %152 : vector<32x32xf32>
    %c0_67 = arith.constant 0 : index
    %c0_68 = arith.constant 0 : index
    %c0_69 = arith.constant 0 : index
    %154 = vector.load %arg17[%c0_67, %c0_68, %c0_69] : memref<1x1x32xf32, #tpu.memory_space<vmem>>, vector<1x1x32xf32>
    %155 = vector.shape_cast %154 : vector<1x1x32xf32> to vector<1x32xf32>
    %156 = vector.broadcast %155 : vector<1x32xf32> to vector<32x32xf32>
    %157 = arith.addf %153, %156 : vector<32x32xf32>
    %c0_70 = arith.constant 0 : index
    %c0_71 = arith.constant 0 : index
    %158 = vector.load %arg21[%c0_70, %c0_71] : memref<32x32xf32, #tpu.memory_space<vmem>>, vector<32x32xf32>
    tpu.vector_store %arg21[%c0_70, %c0_71], %157 {strides = array<i32>} : memref<32x32xf32, #tpu.memory_space<vmem>>, vector<32x32xf32>,
    %c1_i32 = arith.constant 1 : i32
    %159 = arith.cmpi eq, %arg1, %c1_i32 : i32
    %160 = arith.extui %159 : i1 to i32
    %c0_i32_72 = arith.constant 0 : i32
    %161 = arith.cmpi ne, %160, %c0_i32_72 : i32
    scf.if %161 {
      %c0_73 = arith.constant 0 : index
      %c0_74 = arith.constant 0 : index
      %162 = vector.load %arg18[%c0_73, %c0_74] : memref<1x32xf32, #tpu.memory_space<vmem>>, vector<1x32xf32>
      %c0_75 = arith.constant 0 : index
      %c0_76 = arith.constant 0 : index
      %163 = vector.load %arg19[%c0_75, %c0_76] : memref<1x32xf32, #tpu.memory_space<vmem>>, vector<1x32xf32>
      %cst_77 = arith.constant dense<0.000000e+00> : vector<32xf32>
      %164 = vector.multi_reduction <add>, %157, %cst_77 [1] : vector<32x32xf32> to vector<32xf32>
      %165 = vector.shape_cast %164 : vector<32xf32> to vector<32x1xf32>
      %cst_78 = arith.constant 3.200000e+01 : f32
      %166 = vector.broadcast %cst_78 : f32 to vector<32x1xf32>
      %167 = arith.divf %165, %166 : vector<32x1xf32>
      %168 = vector.broadcast %167 : vector<32x1xf32> to vector<32x32xf32>
      %169 = arith.subf %157, %168 : vector<32x32xf32>
      %170 = arith.mulf %169, %169 : vector<32x32xf32>
      %cst_79 = arith.constant dense<0.000000e+00> : vector<32xf32>
      %171 = vector.multi_reduction <add>, %170, %cst_79 [1] : vector<32x32xf32> to vector<32xf32>
      %172 = vector.shape_cast %171 : vector<32xf32> to vector<32x1xf32>
      %cst_80 = arith.constant 3.200000e+01 : f32
      %173 = vector.broadcast %cst_80 : f32 to vector<32x1xf32>
      %174 = arith.divf %172, %173 : vector<32x1xf32>
      %cst_81 = arith.constant 9.99999974E-6 : f32
      %175 = vector.broadcast %cst_81 : f32 to vector<32x1xf32>
      %176 = arith.addf %174, %175 : vector<32x1xf32>
      %177 = math.rsqrt %176 : vector<32x1xf32>
      %178 = vector.broadcast %177 : vector<32x1xf32> to vector<32x32xf32>
      %179 = arith.mulf %169, %178 : vector<32x32xf32>
      %180 = vector.broadcast %162 : vector<1x32xf32> to vector<32x32xf32>
      %181 = arith.mulf %179, %180 : vector<32x32xf32>
      %182 = vector.broadcast %163 : vector<1x32xf32> to vector<32x32xf32>
      %183 = arith.addf %181, %182 : vector<32x32xf32>
      %c0_82 = arith.constant 0 : index
      %c0_83 = arith.constant 0 : index
      %c0_84 = arith.constant 0 : index
      %184 = vector.load %arg20[%c0_82, %c0_83, %c0_84] : memref<1x32x32xf32, #tpu.memory_space<vmem>>, vector<1x32x32xf32>
      %185 = vector.shape_cast %184 : vector<1x32x32xf32> to vector<32x32xf32>
      %186 = vector.shape_cast %183 : vector<32x32xf32> to vector<1x32x32xf32>
      tpu.vector_store %arg20[%c0_82, %c0_83, %c0_84], %186 {strides = array<i32>} : memref<1x32x32xf32, #tpu.memory_space<vmem>>, vector<1x32x32xf32>,
    } else {
    }
    return
  }
  func.func @transform_0(%arg0: i32, %arg1: i32) -> (i32, i32, i32) {
    %c0_i32 = arith.constant 0 : i32
    %c0_i32_0 = arith.constant 0 : i32
    %c0_i32_1 = arith.constant 0 : i32
    return %arg0, %c0_i32, %c0_i32_0 : i32, i32, i32
  }
  func.func @transform_1(%arg0: i32, %arg1: i32) -> (i32, i32, i32) {
    %c0_i32 = arith.constant 0 : i32
    %c0_i32_0 = arith.constant 0 : i32
    %c0_i32_1 = arith.constant 0 : i32
    return %arg0, %c0_i32, %c0_i32_0 : i32, i32, i32
  }
  func.func @transform_2(%arg0: i32, %arg1: i32) -> (i32, i32) {
    %c0_i32 = arith.constant 0 : i32
    %c0_i32_0 = arith.constant 0 : i32
    %c0_i32_1 = arith.constant 0 : i32
    return %c0_i32, %c0_i32_0 : i32, i32
  }
  func.func @transform_3(%arg0: i32, %arg1: i32) -> (i32, i32) {
    %c0_i32 = arith.constant 0 : i32
    %c0_i32_0 = arith.constant 0 : i32
    %c0_i32_1 = arith.constant 0 : i32
    return %c0_i32, %c0_i32_0 : i32, i32
  }
  func.func @transform_4(%arg0: i32, %arg1: i32) -> (i32, i32, i32) {
    %c0_i32 = arith.constant 0 : i32
    %c0_i32_0 = arith.constant 0 : i32
    %c0_i32_1 = arith.constant 0 : i32
    return %arg1, %c0_i32, %c0_i32_0 : i32, i32, i32
  }
  func.func @transform_5(%arg0: i32, %arg1: i32) -> (i32, i32, i32) {
    %c0_i32 = arith.constant 0 : i32
    %c0_i32_0 = arith.constant 0 : i32
    %c0_i32_1 = arith.constant 0 : i32
    return %arg1, %c0_i32, %c0_i32_0 : i32, i32, i32
  }
  func.func @transform_6(%arg0: i32, %arg1: i32) -> (i32, i32, i32) {
    %c0_i32 = arith.constant 0 : i32
    %c0_i32_0 = arith.constant 0 : i32
    %c0_i32_1 = arith.constant 0 : i32
    return %arg1, %c0_i32, %c0_i32_0 : i32, i32, i32
  }
  func.func @transform_7(%arg0: i32, %arg1: i32) -> (i32, i32, i32) {
    %c0_i32 = arith.constant 0 : i32
    %c0_i32_0 = arith.constant 0 : i32
    %c0_i32_1 = arith.constant 0 : i32
    return %arg1, %c0_i32, %c0_i32_0 : i32, i32, i32
  }
  func.func @transform_8(%arg0: i32, %arg1: i32) -> (i32, i32, i32) {
    %c0_i32 = arith.constant 0 : i32
    %c0_i32_0 = arith.constant 0 : i32
    %c0_i32_1 = arith.constant 0 : i32
    return %arg1, %c0_i32, %c0_i32_0 : i32, i32, i32
  }
  func.func @transform_9(%arg0: i32, %arg1: i32) -> (i32, i32, i32) {
    %c0_i32 = arith.constant 0 : i32
    %c0_i32_0 = arith.constant 0 : i32
    %c0_i32_1 = arith.constant 0 : i32
    return %arg1, %c0_i32, %c0_i32_0 : i32, i32, i32
  }
  func.func @transform_10(%arg0: i32, %arg1: i32) -> (i32, i32, i32) {
    %c0_i32 = arith.constant 0 : i32
    %c0_i32_0 = arith.constant 0 : i32
    %c0_i32_1 = arith.constant 0 : i32
    return %arg1, %c0_i32, %c0_i32_0 : i32, i32, i32
  }
  func.func @transform_11(%arg0: i32, %arg1: i32) -> (i32, i32, i32) {
    %c0_i32 = arith.constant 0 : i32
    %c0_i32_0 = arith.constant 0 : i32
    %c0_i32_1 = arith.constant 0 : i32
    return %arg1, %c0_i32, %c0_i32_0 : i32, i32, i32
  }
  func.func @transform_12(%arg0: i32, %arg1: i32) -> (i32, i32, i32) {
    %c0_i32 = arith.constant 0 : i32
    %c0_i32_0 = arith.constant 0 : i32
    %c0_i32_1 = arith.constant 0 : i32
    return %arg1, %c0_i32, %c0_i32_0 : i32, i32, i32
  }
  func.func @transform_13(%arg0: i32, %arg1: i32) -> (i32, i32, i32) {
    %c0_i32 = arith.constant 0 : i32
    %c0_i32_0 = arith.constant 0 : i32
    %c0_i32_1 = arith.constant 0 : i32
    return %arg1, %c0_i32, %c0_i32_0 : i32, i32, i32
  }
  func.func @transform_14(%arg0: i32, %arg1: i32) -> (i32, i32, i32) {
    %c0_i32 = arith.constant 0 : i32
    %c0_i32_0 = arith.constant 0 : i32
    %c0_i32_1 = arith.constant 0 : i32
    return %arg1, %c0_i32, %c0_i32_0 : i32, i32, i32
  }
  func.func @transform_15(%arg0: i32, %arg1: i32) -> (i32, i32, i32) {
    %c0_i32 = arith.constant 0 : i32
    %c0_i32_0 = arith.constant 0 : i32
    %c0_i32_1 = arith.constant 0 : i32
    return %arg1, %c0_i32, %c0_i32_0 : i32, i32, i32
  }
  func.func @transform_16(%arg0: i32, %arg1: i32) -> (i32, i32) {
    %c0_i32 = arith.constant 0 : i32
    %c0_i32_0 = arith.constant 0 : i32
    %c0_i32_1 = arith.constant 0 : i32
    return %c0_i32, %c0_i32_0 : i32, i32
  }
  func.func @transform_17(%arg0: i32, %arg1: i32) -> (i32, i32) {
    %c0_i32 = arith.constant 0 : i32
    %c0_i32_0 = arith.constant 0 : i32
    %c0_i32_1 = arith.constant 0 : i32
    return %c0_i32, %c0_i32_0 : i32, i32
  }
  func.func @transform_18(%arg0: i32, %arg1: i32) -> (i32, i32, i32) {
    %c0_i32 = arith.constant 0 : i32
    %c0_i32_0 = arith.constant 0 : i32
    %c0_i32_1 = arith.constant 0 : i32
    return %arg0, %c0_i32, %c0_i32_0 : i32, i32, i32
  }
}

</mosaic_0001>

<bundles_post_ra>
// kernel: tpu_custom_call.1
= control target key start
LH: loop header
LB: loop body
LE: loop exit
PB: predicated region body
PF: predicated region fallthrough
CT: control target
= control target key end

     0   :  { %s3815_s0 = inlined_call_operand.vmem [shape: f32[2,32,32], index: 0, kind: input, shape index: {}]   ;;  %s3816_s1 = inlined_call_operand.vmem [shape: f32[2,32,32], index: 1, kind: input, shape index: {}]   ;;  %s3817_s2 = inlined_call_operand.vmem [shape: f32[32,128], index: 2, kind: input, shape index: {}]   ;;  %s3818_s3 = inlined_call_operand.vmem [shape: f32[128,32], index: 3, kind: input, shape index: {}]   ;;  %s3819_s4 = inlined_call_operand.vmem [shape: f32[2,1,32], index: 4, kind: input, shape index: {}]   ;;  %s3820_s5 = inlined_call_operand.vmem [shape: f32[2,1,32], index: 5, kind: input, shape index: {}]   ;;  %s3821_s6 = inlined_call_operand.vmem [shape: f32[2,32,96], index: 6, kind: input, shape index: {}]   ;;  %s3822_s7 = inlined_call_operand.vmem [shape: f32[2,1,96], index: 7, kind: input, shape index: {}]   ;;  %s3823_s8 = inlined_call_operand.vmem [shape: f32[2,32,32], index: 8, kind: input, shape index: {}]   ;;  %s3824_s9 = inlined_call_operand.vmem [shape: f32[2,1,32], index: 9, kind: input, shape index: {}]   ;;  %s3825_s10 = inlined_call_operand.vmem [shape: f32[2,1,32], index: 10, kind: input, shape index: {}]   ;;  %s3826_s11 = inlined_call_operand.vmem [shape: f32[2,1,32], index: 11, kind: input, shape index: {}]   ;;  %s3827_s12 = inlined_call_operand.vmem [shape: f32[2,32,128], index: 12, kind: input, shape index: {}]   ;;  %s3828_s13 = inlined_call_operand.vmem [shape: f32[2,1,128], index: 13, kind: input, shape index: {}]   ;;  %s3829_s14 = inlined_call_operand.vmem [shape: f32[2,128,32], index: 14, kind: input, shape index: {}]   ;;  %s3830_s15 = inlined_call_operand.vmem [shape: f32[2,1,32], index: 15, kind: input, shape index: {}]   ;;  %s3831_s16 = inlined_call_operand.vmem [shape: f32[1,32], index: 16, kind: input, shape index: {}]   ;;  %s3832_s17 = inlined_call_operand.vmem [shape: f32[1,32], index: 17, kind: input, shape index: {}]   ;;  %s3833_s18 = inlined_call_operand.hbm [shape: f32[2,32,32], index: 18, kind: output, shape index: {}]  }
   0x1   :  { %3851 = sst [smem:[#allocation19_spill]] %s3815_s0 }
   0x2   :  { %3852 = sst [smem:[#allocation20_spill]] %s3816_s1 }
   0x3   :  { %3853 = sst [smem:[#allocation21_spill]] %s3817_s2 }
   0x4   :  { %3854 = sst [smem:[#allocation22_spill]] %s3818_s3 }
   0x5   :  { %3855 = sst [smem:[#allocation23_spill]] %s3821_s6 }
   0x6   :  { %3856 = sst [smem:[#allocation24_spill]] %s3823_s8 }
   0x7   :  { %3857 = sst [smem:[#allocation25_spill]] %s3824_s9 }
   0x8   :  { %3858 = sst [smem:[#allocation26_spill]] %s3829_s14 }
   0x9   :  { %3859 = sst [smem:[#allocation27_spill]] %s3830_s15 }
   0xa   :  { %3860 = sst [smem:[#allocation28_spill]] %s3831_s16 }
   0xb   :  { %3861 = sst [smem:[#allocation29_spill]] %s3832_s17 }
   0xc   :  { %3862 = sst [smem:[#allocation30_spill]] %s3833_s18 }
   0xd   :  { %23 = vsyncpa [#allocation4], 0 }
   0xe   :  { %25 = vsyncpa [#allocation4 + $0x1], 0  ;;  %s2995_s27 = smov 0   ;;  %s2997_s28 = smov 0  }
   0xf   :  { %s2999_s29 = smov 0   ;;  %s3001_s30 = smov 0  }
  0x10   :  { %s3003_s0 = smov 0   ;;  %s3005_s19 = smov 0  }
  0x11   :  { %s3007_s1 = smov 0   ;;  %s3009_s20 = smov 0  }
  0x12 LB: > { %3863 = sst [smem:[#allocation6_spill]] %s2864_s27  ;;  %s2376_s21 = sadd.s32 4294967295, %s2892_s20   ;;  %s2892_s20 = sphi %s3009_s20, %s31_s20   ;;  %s2888_s1 = sphi %s3007_s1, %s3914_s1   ;;  %s2884_s19 = sphi %s3005_s19, %s3913_s19   ;;  %s2880_s0 = sphi %s3003_s0, %s3912_s0   ;;  %s2876_s30 = sphi %s3001_s30, %s3911_s30   ;;  %s2872_s29 = sphi %s2999_s29, %s3910_s29   ;;  %s2868_s28 = sphi %s2997_s28, %s3909_s28   ;;  %s2864_s27 = sphi %s2995_s27, %s3908_s27  }
  0x13   : > { %3864 = sst [smem:[#allocation7_spill]] %s2868_s28  ;;  %s2377_s22 = sadd.s32 4294967294, %s2892_s20  }
  0x14   : > { %3865 = sst [smem:[#allocation8_spill]] %s2872_s29  ;;  %s40_s2 = sadd.s32 1, %s2884_s19 }
  0x15   : > { %3866 = sst [smem:[#allocation9_spill]] %s2876_s30  ;;  %p41_p0 = scmp.ge.s32.totalorder %s40_s2, 2 }
  0x16   : > { %3867 = sst [smem:[#allocation10_spill]] %s2880_s0  ;;  %s43_s23 = sadd.s32 1, %s2888_s1 }
  0x17   : > { %3868 = sst [smem:[#allocation11_spill]] %s2884_s19  ;;  %p508_p1 = scmp.ne.s32.totalorder %s2872_s29, %s2868_s28 }
  0x18   : > { %3869 = sst [smem:[#allocation12_spill]] %s2888_s1  ;;  %p509_p2 = scmp.eq.s32.totalorder %s2376_s21, 3 }
  0x19   : > { %3870 = sst [smem:[#allocation13_spill]] %s2892_s20  ;;  %s3916_s2 = smov (%p41_p0, %s40_s2), 0 }
  0x1a   : > { %3871 = sst [smem:[#allocation14_spill]] %s3916_s2  ;;  %s3918_s23 = smov (!%p41_p0, %s43_s23), %s2888_s1 }
  0x1b   : > { %p3044_p3 = por %p509_p2, %p508_p1  ;;  %p514_p4 = scmp.ne.s32.totalorder %s2868_s28, %s2864_s27 }
  0x1c   : > { %p45_p5 = scmp.ge.s32.totalorder %s3918_s23, 2  ;;  %p515_p6 = scmp.eq.s32.totalorder %s2377_s22, 3 }
  0x1d   : > { %s3872_s24 = scalar_select %p3044_p3, 1, 0 }
  0x1e   : > { %p2380_p7 = scmp.ge.s32.totalorder %s2892_s20, 1  ;;  %p641_p8 = scmp.lt.s32.totalorder %s2892_s20, 5 }
  0x1f   : > { %3873 = sst [smem:[#allocation15_spill]] %s3872_s24  ;;  %s3920_s23 = smov (%p45_p5, %s3918_s23), 0 }
  0x20   : > { %3874 = sst [smem:[#allocation16_spill]] %s3920_s23  ;;  %p3054_p9 = por %p515_p6, %p514_p4 }
  0x21   : > { %p642_p10 = pnand %p2380_p7, %p641_p8  ;;  %s495_s26 = ssub.s32 %s2888_s1, %s3920_s23 }
  0x22   : > { %s3875_s25 = scalar_select %p3054_p9, 1, 0 }
  0x23   : > { %s498_s21 = sadd.s32 1, %s2872_s29  ;;  %p496_p11 = scmp.eq.s32.totalorder %s495_s26, 0 }
  0x24   : > { %3876 = sst [smem:[#allocation17_spill]] %s3875_s25  ;;  %645 = sbr.rel (%p642_p10) target bundleno = 2991 (0xbaf), region = 92 }
  0x25   : > { %s3062_s2 = scalar_select %p496_p11, %s2872_s29, %s498_s21  }
  0x26   : > { %s3840_s22 = sand.u32 (!%p642_p10), 1, %s2868_s28   ;;  %p744_p12 = scmp.lt.s32.totalorder (!%p642_p10), %s2880_s0, 1 }
  0x27   : > { %3877 = sst [smem:[#allocation18_spill]] %s3062_s2  ;;  %s2381_s19 = sshll.u32 (!%p642_p10), %s3840_s22, 5 }
  0x28   : > { %p754_p13 = scmp.lt.s32.totalorder (!%p642_p10), %s2876_s30, 1  ;;  %s3878_s1 = sld [smem:[#allocation19_spill]] (!%p642_p10) }
  0x29   : > { %s745_s27 = scalar_select %p744_p12, %s2880_s0, 1 }
  0x2a   : > { %s3071_s25 = scalar_select %p754_p13, %s2876_s30, 1 }
  0x2b   : > { %s2425_s26 = sshll.u32 %s745_s27, 5  ;;  %s3879_s20 = sld [smem:[#allocation20_spill]] }
  0x2c   : > { %s2427_s30 = sshll.u32 %s3071_s25, 5  ;;  %s3880_s6 = sld [smem:[#allocation23_spill]] }
  0x2d   : > { %s3881_s8 = sld [smem:[#allocation24_spill]]  ;;  %s3117_s0 = scalar_lea.vmem %s3827_s12, %s2427_s30 }
  0x2e   : > { %s748_s2 = scalar_lea.vmem %s3878_s1, %s2425_s26  ;;  %s3883_s16 = sld [smem:[#allocation26_spill]] }
  0x2f   : > { %s3884_s3 = sld [smem:[#allocation27_spill]]  ;;  %s3133_s27 = scalar_lea.vmem [#allocation3], %s2381_s19 }
  0x30   : > { %s3885_s14 = sld [smem:[#allocation9_spill]] }
  0x31   : > { %s753_s18 = scalar_lea.vmem %s3879_s20, %s2425_s26 }
  0x32   : > { %s3095_s1 = scalar_lea.vmem %s3880_s6, %s2427_s30  ;;  %s789_s6 = scalar_lea.vmem %s3828_s13, %s3071_s25 }
  0x33   : > { %s3100_s22 = scalar_lea.vmem %s3881_s8, %s2427_s30  ;;  %s2430_s8 = sshll.u32 %s3071_s25, 7 }
  0x34   : > { %s3127_s9 = scalar_lea.vmem %s3883_s16, %s2430_s8 }
  0x35   : > { %s797_s15 = scalar_lea.vmem %s3884_s3, %s3071_s25 }
  0x36   : > { %p2394_p0 = scmp.ne.s32.totalorder %s3885_s14, 0 }
  0x38   : > { %802 = sbr.rel (%p2394_p0) target bundleno = 68 (0x44), region = 96 }
  0x3d   : > { %v803_v0 = vld [vmem:[%s748_s2] sm:$0xff]  ;;  %vm815_vm0 = vcmask 261120   ;;  %v804_v2 = vld [vmem:[%s748_s2 + $0x8] sm:$0xff]  ;;  %v805_v5 = vld [vmem:[%s748_s2 + $0x10] sm:$0xff] }
  0x3e   : > { %v807_v1 = vld [vmem:[%s753_s18] sm:$0xff]  ;;  %v808_v4 = vld [vmem:[%s753_s18 + $0x8] sm:$0xff]  ;;  %v809_v6 = vld [vmem:[%s753_s18 + $0x10] sm:$0xff] }
  0x3f   : > { %v811_v3 = vadd.f32 %v807_v1, %v803_v0  ;;  %v812_v7 = vadd.f32 %v808_v4, %v804_v2  ;;  %v813_v8 = vadd.f32 %v809_v6, %v805_v5  ;;  %v806_v9 = vld [vmem:[%s748_s2 + $0x18] sm:$0xff] }
  0x40   : > { %v810_v10 = vld [vmem:[%s753_s18 + $0x18] sm:$0xff] }
  0x41   : > { %816 = vst.msk [vmem:[#allocation2] sm:$0xff] %vm815_vm0, %v811_v3  ;;  %v814_v11 = vadd.f32 %v810_v10, %v806_v9  ;;  %817 = vst.msk [vmem:[#allocation2 + $0x8] sm:$0xff] %vm815_vm0, %v812_v7 }
  0x42   : > { %818 = vst.msk [vmem:[#allocation2 + $0x10] sm:$0xff] %vm815_vm0, %v813_v8 }
  0x43   : > { %819 = vst.msk [vmem:[#allocation2 + $0x18] sm:$0xff] %vm815_vm0, %v814_v11 }
  0x44 PF: > { %vm842_vm1 = vcmask 261120   ;;  %v919_v40 = vld [vmem:[%s3095_s1 + $0x18] sm:$0xff]  ;;  %v918_v41 = vld [vmem:[%s3095_s1 + $0x10] sm:$0xff]  ;;  %v917_v42 = vld [vmem:[%s3095_s1 + $0x8] sm:$0xff]  ;;  %s3886_s14 = sld [smem:[#allocation22_spill]]  ;;  %s2894_s18 = smov 32  }
  0x45   : > { %2496 = vmatprep.subr.mxu1 %v919_v40  ;;  %v916_v43 = vld [vmem:[%s3095_s1] sm:$0xff]  ;;  %s3887_s2 = scalar_lea.vmem %s3819_s4, %s3071_s25  ;;  %s3888_s23 = scalar_lea.vmem %s3820_s5, %s3071_s25  ;;  %vm1337_vm2 = vcmask 523520   ;;  %vm1398_vm3 = vcmask 785920   ;;  %vm1459_vm4 = vcmask 1048320   ;;  %vm1524_vm5 = vcmask 523264  }
  0x46   : > { %2497 = vmatpush3.msra.mxu1 %v919_v40  ;;  %v2395_v9 = vld [vmem:[%s3887_s2] ss:$0 sm:$0xff]  ;;  %s3889_s20 = scalar_lea.vmem %s3822_s7, %s3071_s25  ;;  %s2895_s28 = smov 96   ;;  %vm1529_vm6 = vcmask 785408  }
  0x47   : > { %2498 = vmatprep.subr.mxu1 %v918_v41  ;;  %v2396_v11 = vld [vmem:[%s3888_s23] ss:$0 sm:$0xff]  ;;  %s2896_s24 = smov 64   ;;  %s3890_s3 = sld [smem:[#allocation21_spill]] }
  0x48   : > { %v820_v12 = vld [vmem:[#allocation2] sm:$0xff]  ;;  %v821_v14 = vld [vmem:[#allocation2 + $0x8] sm:$0xff]  ;;  %2499 = vmatpush3.msra.mxu1 %v918_v41  ;;  %s3891_s21 = sld [smem:[#allocation25_spill]]  ;;  %s3894_s17 = scalar_lea.vmem %s3826_s11, %s3071_s25 }
  0x49   : > { %v822_v13 = vld [vmem:[#allocation2 + $0x10] sm:$0xff]  ;;  %v843_v15 = vsel %vm842_vm1, %v820_v12, 0.0  ;;  %v846_v18 = vsel %vm842_vm1, %v821_v14, 0.0  ;;  %2500 = vmatprep.subr.mxu1 %v917_v42 }
  0x4a   : > { %v849_v16 = vsel %vm842_vm1, %v822_v13, 0.0  ;;  %v823_v17 = vld [vmem:[#allocation2 + $0x18] sm:$0xff]  ;;  %844 = vadd.xlane.f32.xlu0 %v843_v15  ;;  %2501 = vmatpush3.msra.mxu1 %v917_v42  ;;  %v3174_v45 = vld [vmem:[%s3886_s14 + $0x70] sm:$0xff]  ;;  %v3179_v46 = vld [vmem:[%s3886_s14 + $0x60] sm:$0xff] }
  0x4b   : > { %850 = vadd.xlane.f32.xlu1 %v849_v16  ;;  %v852_v19 = vsel %vm842_vm1, %v823_v17, 0.0  ;;  %2502 = vmatprep.subr.mxu1 %v916_v43  ;;  %v3167_v44 = vld [vmem:[%s3886_s14 + $0x78] sm:$0xff]  ;;  %v3186_v47 = vld [vmem:[%s3886_s14 + $0x50] sm:$0xff]  ;;  %v3193_v48 = vld [vmem:[%s3886_s14 + $0x68] sm:$0xff] }
  0x4c   : > { %2503 = vmatpush3.msra.mxu1 %v916_v43  ;;  %v3200_v49 = vld [vmem:[%s3886_s14 + $0x40] sm:$0xff]  ;;  %v3207_v50 = vld [vmem:[%s3886_s14 + $0x58] sm:$0xff]  ;;  %v3214_v51 = vld [vmem:[%s3886_s14 + $0x30] sm:$0xff] }
  0x4d   : > { %v3221_v52 = vld [vmem:[%s3886_s14 + $0x48] sm:$0xff]  ;;  %v3228_v53 = vld [vmem:[%s3886_s14 + $0x20] sm:$0xff]  ;;  %v3235_v54 = vld [vmem:[%s3886_s14 + $0x38] sm:$0xff] }
  0x4e   : > { %847 = vadd.xlane.f32.xlu0 %v846_v18  ;;  %v3242_v55 = vld [vmem:[%s3886_s14 + $0x10] sm:$0xff]  ;;  %v3249_v56 = vld [vmem:[%s3886_s14 + $0x28] sm:$0xff]  ;;  %v3256_v57 = vld [vmem:[%s3886_s14] sm:$0xff]  ;;  %s3892_s29 = scalar_lea.vmem %s3891_s21, %s3071_s25 }
  0x4f   : > { %853 = vadd.xlane.f32.xlu1 %v852_v19  ;;  %v3263_v58 = vld [vmem:[%s3886_s14 + $0x18] sm:$0xff]  ;;  %v3272_v59 = vld [vmem:[%s3886_s14 + $0x8] sm:$0xff] }
  0xd3   : > { %v845_v20 = vpop.xlane.xlu0 %844 }
  0xd4   : > { %v851_v21 = vpop.xlane.xlu1 %850  ;;  %v856_v22 = vmul.f32 0.03125, %v845_v20 }
  0xd5   : > { %v858_v23 = vmul.f32 0.03125, %v851_v21 }
  0xd6   : > { %v3140_v24 = vsub.f32 %v820_v12, %v856_v22 }
  0xd7   : > { %v3142_v25 = vsub.f32 %v822_v13, %v858_v23  ;;  %v848_v26 = vpop.xlane.xlu0 %847 }
  0xd8   : > { %v854_v27 = vpop.xlane.xlu1 %853  ;;  %v857_v28 = vmul.f32 0.03125, %v848_v26  ;;  %v864_v30 = vmul.f32 %v3140_v24, %v3140_v24 }
  0xd9   : > { %v859_v29 = vmul.f32 0.03125, %v854_v27  ;;  %v866_v31 = vmul.f32 %v3142_v25, %v3142_v25 }
  0xda   : > { %v3148_v32 = vsub.f32 %v821_v14, %v857_v28  ;;  %v868_v34 = vsel %vm842_vm1, %v864_v30, 0.0 }
  0xdb   : > { %v3150_v33 = vsub.f32 %v823_v17, %v859_v29  ;;  %869 = vadd.xlane.f32.xlu0 %v868_v34  ;;  %v874_v35 = vsel %vm842_vm1, %v866_v31, 0.0 }
  0xdc   : > { %v865_v36 = vmul.f32 %v3148_v32, %v3148_v32 }
  0xdd   : > { %v867_v37 = vmul.f32 %v3150_v33, %v3150_v33 }
  0xde   : > { %v871_v38 = vsel %vm842_vm1, %v865_v36, 0.0  ;;  %v2397_v36 = vld [vmem:[%s3889_s20] ss:$0 sm:$0xff]  ;;  %s3893_s20 = scalar_lea.vmem %s3825_s10, %s3071_s25  ;;  %s3896_s25 = sld [smem:[#allocation9_spill]] }
  0xdf   : > { %875 = vadd.xlane.f32.xlu0 %v874_v35  ;;  %872 = vadd.xlane.f32.xlu1 %v871_v38  ;;  %v877_v39 = vsel %vm842_vm1, %v867_v37, 0.0 }
  0xe3   : > { %878 = vadd.xlane.f32.xlu1 %v877_v39 }
  0xe4   : > { %p2417_p1 = scmp.ne.s32.totalorder %s3896_s25, 1 }
  0xe5   : > { %s3897_s2 = sld [smem:[#allocation28_spill]] (!%p2417_p1) }
  0xf4   : > { %1070 = vrot.lane.b32.xlu1 %v3167_v44, %s2894_s18 }
  0xf5   : > { %1068 = vrot.lane.b32.xlu0 %v3174_v45, %s2894_s18 }
  0xf8   : > { %1064 = vrot.lane.b32.xlu1 %v3179_v46, %s2894_s18 }
  0xf9   : > { %1060 = vrot.lane.b32.xlu0 %v3186_v47, %s2894_s18 }
  0xfc   : > { %1066 = vrot.lane.b32.xlu1 %v3193_v48, %s2894_s18 }
  0xfd   : > { %1056 = vrot.lane.b32.xlu0 %v3200_v49, %s2894_s18 }
 0x100   : > { %1062 = vrot.lane.b32.xlu1 %v3207_v50, %s2894_s18 }
 0x101   : > { %1052 = vrot.lane.b32.xlu0 %v3214_v51, %s2894_s18 }
 0x104   : > { %1058 = vrot.lane.b32.xlu1 %v3221_v52, %s2894_s18 }
 0x105   : > { %1048 = vrot.lane.b32.xlu0 %v3228_v53, %s2894_s18 }
 0x108   : > { %1054 = vrot.lane.b32.xlu1 %v3235_v54, %s2894_s18 }
 0x109   : > { %1044 = vrot.lane.b32.xlu0 %v3242_v55, %s2894_s18 }
 0x10c   : > { %1050 = vrot.lane.b32.xlu1 %v3249_v56, %s2894_s18 }
 0x10d   : > { %1040 = vrot.lane.b32.xlu0 %v3256_v57, %s2894_s18 }
 0x110   : > { %1046 = vrot.lane.b32.xlu1 %v3263_v58, %s2894_s18 }
 0x114   : > { %1042 = vrot.lane.b32.xlu1 %v3272_v59, %s2894_s18 }
 0x164   : > { %v870_v60 = vpop.xlane.xlu0 %869 }
 0x165   : > { %v880_v61 = vmul.f32 0.03125, %v870_v60 }
 0x167   : > { %v884_v62 = vadd.f32 1e-05, %v880_v61 }
 0x168   : > { %v873_v63 = vpop.xlane.xlu1 %872  ;;  %v876_v0 = vpop.xlane.xlu0 %875 }
 0x169   : > { %2700 = vrsqrt.f32 %v884_v62  ;;  %v881_v1 = vmul.f32 0.03125, %v873_v63  ;;  %v882_v2 = vmul.f32 0.03125, %v876_v0 }
 0x16b   : > { %v885_v3 = vadd.f32 1e-05, %v881_v1  ;;  %v886_v4 = vadd.f32 1e-05, %v882_v2 }
 0x16c   : > { %v879_v5 = vpop.xlane.xlu1 %878  ;;  %v1069_v28 = vpop.permute.xlu0 %1068 }
 0x16d   : > { %2702 = vrsqrt.f32 %v885_v3  ;;  %v883_v6 = vmul.f32 0.03125, %v879_v5 }
 0x16e   : > { %2704 = vrsqrt.f32 %v886_v4 }
 0x16f   : > { %v887_v7 = vadd.f32 1e-05, %v883_v6 }
 0x170   : > { %v1071_v27 = vpop.permute.xlu1 %1070  ;;  %v1061_v30 = vpop.permute.xlu0 %1060 }
 0x171   : > { %2706 = vrsqrt.f32 %v887_v7 }
 0x176   : > { %v2701_v8 = vpop.eup %2700 }
 0x177   : > { %v892_v10 = vmul.f32 %v2701_v8, %v3140_v24 }
 0x179   : > { %v902_v12 = vmul.f32 %v2395_v9, %v892_v10 }
 0x17a   : > { %v2703_v13 = vpop.eup %2702 }
 0x17b   : > { %v2705_v14 = vpop.eup %2704  ;;  %v912_v15 = vadd.f32 %v2396_v11, %v902_v12  ;;  %v893_v16 = vmul.f32 %v2703_v13, %v3148_v32  ;;  %v1057_v32 = vpop.permute.xlu0 %1056 }
 0x17c   : > { %v894_v17 = vmul.f32 %v2705_v14, %v3142_v25  ;;  %v1065_v25 = vpop.permute.xlu1 %1064 }
 0x17d   : > { %2504 = vmatprep.mubr.msk.f32.mxu1 %vm842_vm1, %v912_v15  ;;  %v903_v18 = vmul.f32 %v2395_v9, %v893_v16 }
 0x17e   : > { %v2707_v19 = vpop.eup %2706  ;;  %v904_v20 = vmul.f32 %v2395_v9, %v894_v17 }
 0x17f   : > { %v913_v21 = vadd.f32 %v2396_v11, %v903_v18  ;;  %v895_v22 = vmul.f32 %v2707_v19, %v3150_v33  ;;  %v1053_v35 = vpop.permute.xlu0 %1052 }
 0x180   : > { %v914_v23 = vadd.f32 %v2396_v11, %v904_v20  ;;  %v1067_v29 = vpop.permute.xlu1 %1066 }
 0x181   : > { %2505 = vmatmul.mubr.msk.f32.vlgmr.msra.gmra.mxu1 %vm842_vm1, %v913_v21  ;;  %v905_v24 = vmul.f32 %v2395_v9, %v895_v22 }
 0x182   : > { %2507 = vmatprep.mubr.msk.f32.mxu1 %vm842_vm1, %v914_v23 }
 0x183   : > { %v915_v26 = vadd.f32 %v2396_v11, %v905_v24  ;;  %v1049_v37 = vpop.permute.xlu0 %1048 }
 0x184   : > { %v1063_v31 = vpop.permute.xlu1 %1062 }
 0x185   : > { %2508 = vmatmul.mubr.msk.f32.gmra.mxu1 %vm842_vm1, %v915_v26 }
 0x187   : > { %v1045_v0 = vpop.permute.xlu0 %1044 }
 0x188   : > { %v1059_v34 = vpop.permute.xlu1 %1058 }
 0x18b   : > { %v1041_v13 = vpop.permute.xlu0 %1040 }
 0x18c   : > { %v1055_v33 = vpop.permute.xlu1 %1054 }
 0x190   : > { %v1051_v40 = vpop.permute.xlu1 %1050 }
 0x194   : > { %v1047_v5 = vpop.permute.xlu1 %1046 }
 0x198   : > { %v1043_v16 = vpop.permute.xlu1 %1042 }
 0x241   : > { %v2506_v38 = vpop.f32.mrf.mxu1 }
 0x242   : > { %v3299_v39 = vadd.f32 %v2506_v38, %v2397_v36 }
 0x243   : > { %v1005_v41 = vpop.f32.mrf.mxu1 }
 0x244   : > { %v3301_v42 = vadd.f32 %v2397_v36, %v1005_v41  ;;  %v1101_v63 = vmul.f32 %v1067_v29, %v3299_v39  ;;  %v1097_v8 = vmul.f32 %v1059_v34, %v3299_v39  ;;  %v1093_v15 = vmul.f32 %v1051_v40, %v3299_v39 }
 0x245   : > { %v2509_v43 = vpop.f32.mrf.mxu1  ;;  %v1089_v21 = vmul.f32 %v1043_v16, %v3299_v39 }
 0x246   : > { %v3303_v60 = vadd.f32 %v2509_v43, %v2397_v36  ;;  %v1168_v61 = vpack.c.bf16 %v3299_v39, %v3301_v42  ;;  %v1100_v62 = vmul.f32 %v1065_v25, %v3301_v42  ;;  %v1096_v4 = vmul.f32 %v1057_v32, %v3301_v42 }
 0x247   : > { %v1015_v1 = vpop.f32.mrf.mxu1  ;;  %v1092_v12 = vmul.f32 %v1049_v37, %v3301_v42  ;;  %v1088_v17 = vmul.f32 %v1041_v13, %v3301_v42 }
 0x248   : > { %v3309_v2 = vadd.f32 %v2397_v36, %v1015_v1  ;;  %2526 = vmatprep.mubr.msk.bf16.mxu1 %vm842_vm1, %v1168_v61  ;;  %v1176_v3 = vpack.c.bf16 %v1101_v63, %v1100_v62  ;;  %v1103_v7 = vmul.f32 %v1071_v27, %v3303_v60  ;;  %v1174_v10 = vpack.c.bf16 %v1097_v8, %v1096_v4 }
 0x249   : > { %v1099_v14 = vmul.f32 %v1063_v31, %v3303_v60  ;;  %v1172_v19 = vpack.c.bf16 %v1093_v15, %v1092_v12  ;;  %v1095_v22 = vmul.f32 %v1055_v33, %v3303_v60  ;;  %v1170_v23 = vpack.c.bf16 %v1089_v21, %v1088_v17 }
 0x24a   : > { %1198 = vrot.lane.b32.xlu1 %v1176_v3, %s2895_s28  ;;  %v1102_v6 = vmul.f32 %v1069_v28, %v3309_v2  ;;  %v1098_v11 = vmul.f32 %v1061_v30, %v3309_v2  ;;  %v1094_v20 = vmul.f32 %v1053_v35, %v3309_v2  ;;  %v1090_v26 = vmul.f32 %v1045_v0, %v3309_v2 }
 0x24b   : > { %v1091_v27 = vmul.f32 %v1047_v5, %v3303_v60 }
 0x24c   : > { %v1177_v9 = vpack.c.bf16 %v1103_v7, %v1102_v6  ;;  %v1175_v18 = vpack.c.bf16 %v1099_v14, %v1098_v11  ;;  %v1173_v24 = vpack.c.bf16 %v1095_v22, %v1094_v20 }
 0x24d   : > { %v1171_v25 = vpack.c.bf16 %v1091_v27, %v1090_v26 }
 0x24e   : > { %1200 = vrot.lane.b32.xlu0 %v1177_v9, %s2895_s28  ;;  %1194 = vrot.lane.b32.xlu1 %v1174_v10, %s2895_s28 }
 0x252   : > { %1196 = vrot.lane.b32.xlu0 %v1175_v18, %s2895_s28  ;;  %1190 = vrot.lane.b32.xlu1 %v1172_v19, %s2895_s28  ;;  %v1169_v19 = vpack.c.bf16 %v3303_v60, %v3309_v2 }
 0x256   : > { %1192 = vrot.lane.b32.xlu0 %v1173_v24, %s2895_s28  ;;  %1186 = vrot.lane.b32.xlu1 %v1170_v23, %s2895_s28  ;;  %v1287_v23 = vld [vmem:[%s3890_s3 + $0x10] sm:$0xff] }
 0x25a   : > { %1188 = vrot.lane.b32.xlu0 %v1171_v25, %s2895_s28  ;;  %1134 = vrot.lane.b32.xlu1 %v3167_v44, %s2896_s24 }
 0x25e   : > { %1132 = vrot.lane.b32.xlu0 %v3174_v45, %s2896_s24  ;;  %1130 = vrot.lane.b32.xlu1 %v3193_v48, %s2896_s24 }
 0x262   : > { %1128 = vrot.lane.b32.xlu0 %v3179_v46, %s2896_s24  ;;  %1126 = vrot.lane.b32.xlu1 %v3207_v50, %s2896_s24 }
 0x266   : > { %1124 = vrot.lane.b32.xlu0 %v3186_v47, %s2896_s24  ;;  %1122 = vrot.lane.b32.xlu1 %v3221_v52, %s2896_s24 }
 0x26a   : > { %1120 = vrot.lane.b32.xlu0 %v3200_v49, %s2896_s24  ;;  %1118 = vrot.lane.b32.xlu1 %v3235_v54, %s2896_s24 }
 0x26e   : > { %1116 = vrot.lane.b32.xlu0 %v3214_v51, %s2896_s24  ;;  %1114 = vrot.lane.b32.xlu1 %v3249_v56, %s2896_s24 }
 0x272   : > { %1112 = vrot.lane.b32.xlu0 %v3228_v53, %s2896_s24  ;;  %1110 = vrot.lane.b32.xlu1 %v3263_v58, %s2896_s24 }
 0x276   : > { %1108 = vrot.lane.b32.xlu0 %v3242_v55, %s2896_s24  ;;  %1106 = vrot.lane.b32.xlu1 %v3272_v59, %s2896_s24 }
 0x27a   : > { %1104 = vrot.lane.b32.xlu0 %v3256_v57, %s2896_s24 }
 0x2bc   : > { %v1199_v44 = vpop.permute.xlu1 %1198 }
 0x2bd   : > { %v1227_v52 = vsel %vm842_vm1, %v1199_v44, 0 }
 0x2c0   : > { %v1195_v45 = vpop.permute.xlu1 %1194  ;;  %v1201_v46 = vpop.permute.xlu0 %1200 }
 0x2c1   : > { %v1230_v47 = vsel %vm842_vm1, %v1201_v46, 0  ;;  %2616 = vmatprep.subr.msk.bf16.mxu1 %vm842_vm1, %v1201_v46  ;;  %v1221_v36 = vsel %vm842_vm1, %v1195_v45, 0 }
 0x2c2   : > { %2511 = vmatpush3.bf16.xpose.msra.mxu1 %v1230_v47 }
 0x2c3   : > { %2617 = vmatprep.subr.msk.bf16.mxu1 %vm842_vm1, %v1199_v44 }
 0x2c4   : > { %v1191_v48 = vpop.permute.xlu1 %1190  ;;  %v1197_v49 = vpop.permute.xlu0 %1196 }
 0x2c5   : > { %v1224_v57 = vsel %vm842_vm1, %v1197_v49, 0  ;;  %v1215_v13 = vsel %vm842_vm1, %v1191_v48, 0 }
 0x2c8   : > { %v1187_v50 = vpop.permute.xlu1 %1186  ;;  %v1193_v51 = vpop.permute.xlu0 %1192 }
 0x2c9   : > { %v1218_v3 = vsel %vm842_vm1, %v1193_v51, 0  ;;  %v1209_v18 = vsel %vm842_vm1, %v1187_v50, 0 }
 0x2ca   : > { %2513 = vmatpush3.bf16.xpose.msra.mxu1 %v1227_v52 }
 0x2cb   : > { %2618 = vmatprep.subr.msk.bf16.mxu1 %vm842_vm1, %v1197_v49 }
 0x2cc   : > { %v1135_v53 = vpop.permute.xlu1 %1134  ;;  %v1189_v54 = vpop.permute.xlu0 %1188 }
 0x2cd   : > { %v1167_v58 = vmul.f32 %v1135_v53, %v3303_v60  ;;  %v1212_v17 = vsel %vm842_vm1, %v1189_v54, 0  ;;  %v1285_v53 = vld [vmem:[%s3890_s3] sm:$0xff] }
 0x2d0   : > { %v1131_v55 = vpop.permute.xlu1 %1130  ;;  %v1133_v56 = vpop.permute.xlu0 %1132 }
 0x2d1   : > { %v1166_v59 = vmul.f32 %v1133_v56, %v3309_v2  ;;  %v3376_v31 = vmul.f32 %v1131_v55, %v3299_v39 }
 0x2d2   : > { %2515 = vmatpush3.bf16.xpose.msra.mxu1 %v1224_v57 }
 0x2d3   : > { %v1543_v28 = vpack.c.bf16 %v1167_v58, %v1166_v59  ;;  %2619 = vmatprep.subr.msk.bf16.mxu1 %vm842_vm1, %v1195_v45 }
 0x2d4   : > { %v1127_v29 = vpop.permute.xlu1 %1126  ;;  %v1129_v30 = vpop.permute.xlu0 %1128 }
 0x2d5   : > { %v3379_v32 = vmul.f32 %v1129_v30, %v3301_v42  ;;  %1566 = vrot.lane.b32.xlu0 %v1543_v28, %s2896_s24  ;;  %v3386_v37 = vmul.f32 %v1127_v29, %v3303_v60 }
 0x2d7   : > { %v1542_v34 = vpack.c.bf16 %v3376_v31, %v3379_v32 }
 0x2d8   : > { %v1123_v35 = vpop.permute.xlu1 %1122  ;;  %v1125_v33 = vpop.permute.xlu0 %1124 }
 0x2d9   : > { %v3389_v38 = vmul.f32 %v1125_v33, %v3309_v2  ;;  %v3395_v61 = vmul.f32 %v1123_v35, %v3299_v39 }
 0x2da   : > { %2517 = vmatpush3.bf16.xpose.msra.mxu1 %v1221_v36 }
 0x2db   : > { %v1541_v40 = vpack.c.bf16 %v3386_v37, %v3389_v38  ;;  %2620 = vmatprep.subr.msk.bf16.mxu1 %vm842_vm1, %v1193_v51 }
 0x2dc   : > { %v1119_v41 = vpop.permute.xlu1 %1118  ;;  %v1121_v43 = vpop.permute.xlu0 %1120 }
 0x2dd   : > { %v3398_v62 = vmul.f32 %v1121_v43, %v3301_v42  ;;  %v3404_v4 = vmul.f32 %v1119_v41, %v3303_v60 }
 0x2df   : > { %v1540_v63 = vpack.c.bf16 %v3395_v61, %v3398_v62 }
 0x2e0   : > { %v1115_v0 = vpop.permute.xlu1 %1114  ;;  %v1117_v1 = vpop.permute.xlu0 %1116 }
 0x2e1   : > { %v3407_v5 = vmul.f32 %v1117_v1, %v3309_v2  ;;  %v3413_v8 = vmul.f32 %v1115_v0, %v3299_v39 }
 0x2e2   : > { %2519 = vmatpush3.bf16.xpose.msra.mxu1 %v1218_v3 }
 0x2e3   : > { %v1539_v6 = vpack.c.bf16 %v3404_v4, %v3407_v5  ;;  %2621 = vmatprep.subr.msk.bf16.mxu1 %vm842_vm1, %v1191_v48 }
 0x2e4   : > { %v1113_v7 = vpop.permute.xlu0 %1112  ;;  %v1111_v10 = vpop.permute.xlu1 %1110 }
 0x2e5   : > { %v3416_v9 = vmul.f32 %v1113_v7, %v3301_v42  ;;  %v3422_v14 = vmul.f32 %v1111_v10, %v3303_v60  ;;  %v1288_v60 = vld [vmem:[%s3890_s3 + $0x18] sm:$0xff] }
 0x2e7   : > { %v1538_v11 = vpack.c.bf16 %v3413_v8, %v3416_v9 }
 0x2e8   : > { %v1109_v12 = vpop.permute.xlu0 %1108 }
 0x2e9   : > { %v3425_v15 = vmul.f32 %v1109_v12, %v3309_v2 }
 0x2ea   : > { %2521 = vmatpush3.bf16.xpose.msra.mxu1 %v1215_v13 }
 0x2eb   : > { %v1537_v16 = vpack.c.bf16 %v3422_v14, %v3425_v15  ;;  %2622 = vmatprep.subr.msk.bf16.mxu1 %vm842_vm1, %v1189_v54  ;;  %v1286_v54 = vld [vmem:[%s3890_s3 + $0x8] sm:$0xff] }
 0x2ec   : > { %v3436_v20 = vpop.permute.xlu0 %1104 }
 0x2f2   : > { %2523 = vmatpush3.bf16.xpose.msra.mxu1 %v1212_v17 }
 0x2f3   : > { %2623 = vmatprep.subr.msk.bf16.mxu1 %vm842_vm1, %v1187_v50 }
 0x2fa   : > { %2525 = vmatpush3.bf16.xpose.msra.mxu1 %v1209_v18 }
 0x301   : > { %2527 = vmatmul.mubr.msk.bf16.vlgmr.msra.gmra.mxu1 %vm842_vm1, %v1169_v19 }
 0x347   : > { %v1567_v21 = vpop.permute.xlu0 %1566 }
 0x348   : > { %2530 = vmatprep.subr.bf16.mxu0 %v1567_v21 }
 0x349   : > { %2531 = vmatpush3.bf16.msra.mxu0 %v1567_v21 }
 0x3c1   : > { %v2528_v22 = vpop.f32.mrf.mxu1 }
 0x3c2   : > { %v1283_v24 = vmul.f32 0.35355338, %v2528_v22 }
 0x3c3   : > { %v1266_v26 = vpop.f32.mrf.mxu1 }
 0x3c4   : > { %v3441_v27 = vadd.f32 %v1287_v23, %v1283_v24  ;;  %v1281_v49 = vmul.f32 0.35355338, %v1266_v26 }
 0x3c5   : > { %v2529_v25 = vpop.f32.mrf.mxu1 }
 0x3c6   : > { %v1284_v2 = vmul.f32 0.35355338, %v2529_v25  ;;  %v1344_v44 = vsel %vm1337_vm2, %v3441_v27, -inf  ;;  %v1405_v47 = vsel %vm1398_vm3, %v3441_v27, -inf  ;;  %v1466_v52 = vsel %vm1459_vm4, %v3441_v27, -inf }
 0x3c7   : > { %1345 = vmax.xlane.f32.xlu0 %v1344_v44  ;;  %v1269_v48 = vpop.f32.mrf.mxu1  ;;  %v3464_v55 = vadd.f32 %v1285_v53, %v1281_v49  ;;  %v1299_v58 = vsel %vm842_vm1, %v3441_v27, -inf }
 0x3c8   : > { %v3448_v45 = vadd.f32 %v1288_v60, %v1284_v2  ;;  %v1282_v50 = vmul.f32 0.35355338, %v1269_v48  ;;  %v3500_v60 = vpop.permute.xlu1 %1106 }
 0x3c9   : > { %v1338_v28 = vsel %vm1337_vm2, %v3464_v55, -inf  ;;  %v1399_v30 = vsel %vm1398_vm3, %v3464_v55, -inf  ;;  %v1460_v33 = vsel %vm1459_vm4, %v3464_v55, -inf  ;;  %v1293_v41 = vsel %vm842_vm1, %v3464_v55, -inf }
 0x3ca   : > { %v1408_v46 = vsel %vm1398_vm3, %v3448_v45, -inf  ;;  %v1469_v51 = vsel %vm1459_vm4, %v3448_v45, -inf  ;;  %v3466_v56 = vadd.f32 %v1286_v54, %v1282_v50  ;;  %v1302_v57 = vsel %vm842_vm1, %v3448_v45, -inf }
 0x3cb   : > { %1409 = vmax.xlane.f32.xlu1 %v1408_v46  ;;  %1406 = vmax.xlane.f32.xlu0 %v1405_v47  ;;  %v1347_v43 = vsel %vm1337_vm2, %v3448_v45, -inf }
 0x3cc   : > { %v1341_v59 = vsel %vm1337_vm2, %v3466_v56, -inf  ;;  %v1402_v29 = vsel %vm1398_vm3, %v3466_v56, -inf  ;;  %v1463_v35 = vsel %vm1459_vm4, %v3466_v56, -inf  ;;  %v1296_v36 = vsel %vm842_vm1, %v3466_v56, -inf }
 0x3cf   : > { %1470 = vmax.xlane.f32.xlu1 %v1469_v51  ;;  %1467 = vmax.xlane.f32.xlu0 %v1466_v52 }
 0x3d3   : > { %1303 = vmax.xlane.f32.xlu1 %v1302_v57  ;;  %1300 = vmax.xlane.f32.xlu0 %v1299_v58 }
 0x3d7   : > { %1342 = vmax.xlane.f32.xlu1 %v1341_v59  ;;  %1339 = vmax.xlane.f32.xlu0 %v1338_v28 }
 0x3db   : > { %1403 = vmax.xlane.f32.xlu1 %v1402_v29  ;;  %1400 = vmax.xlane.f32.xlu0 %v1399_v30 }
 0x3df   : > { %1464 = vmax.xlane.f32.xlu1 %v1463_v35  ;;  %1461 = vmax.xlane.f32.xlu0 %v1460_v33 }
 0x3e3   : > { %1297 = vmax.xlane.f32.xlu1 %v1296_v36  ;;  %1294 = vmax.xlane.f32.xlu0 %v1293_v41 }
 0x3e7   : > { %1348 = vmax.xlane.f32.xlu0 %v1347_v43 }
 0x450   : > { %v1346_v0 = vpop.xlane.xlu0 %1345 }
 0x451   : > { %v1352_v1 = vsub.f32 %v3441_v27, %v1346_v0 }
 0x453   : > { %v1358_v3 = vmul.f32 1.442695, %v1352_v1 }
 0x454   : > { %v1407_v7 = vpop.xlane.xlu0 %1406  ;;  %v1410_v46 = vpop.xlane.xlu1 %1409 }
 0x455   : > { %2708 = vpow2.f32 %v1358_v3  ;;  %v1413_v10 = vsub.f32 %v3441_v27, %v1407_v7  ;;  %v1414_v49 = vsub.f32 %v3448_v45, %v1410_v46 }
 0x457   : > { %v1419_v12 = vmul.f32 1.442695, %v1413_v10  ;;  %v1421_v57 = vmul.f32 1.442695, %v1414_v49 }
 0x458   : > { %v1468_v13 = vpop.xlane.xlu0 %1467  ;;  %v1471_v51 = vpop.xlane.xlu1 %1470 }
 0x459   : > { %v1474_v17 = vsub.f32 %v3441_v27, %v1468_v13  ;;  %2710 = vpow2.f32 %v1419_v12  ;;  %v1475_v58 = vsub.f32 %v3448_v45, %v1471_v51 }
 0x45b   : > { %v1480_v18 = vmul.f32 1.442695, %v1474_v17  ;;  %v1482_v28 = vmul.f32 1.442695, %v1475_v58 }
 0x45c   : > { %v1301_v19 = vpop.xlane.xlu0 %1300  ;;  %v1304_v0 = vpop.xlane.xlu1 %1303 }
 0x45d   : > { %2712 = vpow2.f32 %v1480_v18  ;;  %v1307_v52 = vsub.f32 %v3441_v27, %v1301_v19  ;;  %v1308_v3 = vsub.f32 %v3448_v45, %v1304_v0 }
 0x45f   : > { %v1313_v59 = vmul.f32 1.442695, %v1307_v52  ;;  %v1315_v7 = vmul.f32 1.442695, %v1308_v3 }
 0x460   : > { %v1340_v21 = vpop.xlane.xlu0 %1339  ;;  %v1343_v12 = vpop.xlane.xlu1 %1342 }
 0x461   : > { %v1350_v22 = vsub.f32 %v3464_v55, %v1340_v21  ;;  %v1351_v18 = vsub.f32 %v3466_v56, %v1343_v12 }
 0x462   : > { %v3494_v23 = vpop.eup %2708 }
 0x463   : > { %v1354_v24 = vmul.f32 1.442695, %v1350_v22  ;;  %1370 = vrot.lane.b32.xlu0 %v3494_v23, %s2895_s28  ;;  %v1356_v21 = vmul.f32 1.442695, %v1351_v18 }
 0x464   : > { %v1401_v26 = vpop.xlane.xlu0 %1400  ;;  %v1404_v17 = vpop.xlane.xlu1 %1403 }
 0x465   : > { %2714 = vpow2.f32 %v1354_v24  ;;  %v1411_v36 = vsub.f32 %v3464_v55, %v1401_v26  ;;  %v1412_v22 = vsub.f32 %v3466_v56, %v1404_v17 }
 0x466   : > { %v3498_v25 = vpop.eup %2710 }
 0x467   : > { %1431 = vrot.lane.b32.xlu0 %v3498_v25, %s2896_s24  ;;  %v1415_v41 = vmul.f32 1.442695, %v1411_v36  ;;  %v1417_v46 = vmul.f32 1.442695, %v1412_v22 }
 0x468   : > { %v1462_v2 = vpop.xlane.xlu0 %1461  ;;  %v1465_v26 = vpop.xlane.xlu1 %1464 }
 0x469   : > { %v1472_v43 = vsub.f32 %v3464_v55, %v1462_v2 }
 0x46a   : > { %v3504_v44 = vpop.eup %2712 }
 0x46b   : > { %1492 = vrot.lane.b32.xlu0 %v3504_v44, %s2894_s18  ;;  %v1476_v1 = vmul.f32 1.442695, %v1472_v43 }
 0x46c   : > { %v1295_v47 = vpop.xlane.xlu0 %1294 }
 0x470   : > { %v1349_v48 = vpop.xlane.xlu0 %1348 }
 0x471   : > { %v1353_v50 = vsub.f32 %v3448_v45, %v1349_v48  ;;  %v1305_v45 = vsub.f32 %v3464_v55, %v1295_v47  ;;  %v1473_v48 = vsub.f32 %v3466_v56, %v1465_v26 }
 0x472   : > { %v3511_v53 = vpop.eup %2714 }
 0x473   : > { %v1360_v54 = vmul.f32 1.442695, %v1353_v50  ;;  %1366 = vrot.lane.b32.xlu1 %v3511_v53, %s2895_s28  ;;  %v1309_v2 = vmul.f32 1.442695, %v1305_v45  ;;  %v1478_v49 = vmul.f32 1.442695, %v1473_v48 }
 0x475   : > { %2716 = vpow2.f32 %v1360_v54  ;;  %v1298_v54 = vpop.xlane.xlu1 %1297 }
 0x476   : > { %2718 = vpow2.f32 %v1421_v57  ;;  %v1306_v31 = vsub.f32 %v3466_v56, %v1298_v54 }
 0x477   : > { %2720 = vpow2.f32 %v1313_v59 }
 0x478   : > { %2722 = vpow2.f32 %v1482_v28  ;;  %v1311_v32 = vmul.f32 1.442695, %v1306_v31 }
 0x479   : > { %2724 = vpow2.f32 %v1415_v41 }
 0x47a   : > { %2726 = vpow2.f32 %v1476_v1 }
 0x47b   : > { %2728 = vpow2.f32 %v1315_v7 }
 0x47c   : > { %2730 = vpow2.f32 %v1356_v21  ;;  %v1152_v21 = vmul.f32 %v3436_v20, %v3301_v42 }
 0x47d   : > { %2732 = vpow2.f32 %v1309_v2 }
 0x47e   : > { %2734 = vpow2.f32 %v1417_v46 }
 0x47f   : > { %2736 = vpow2.f32 %v1478_v49 }
 0x480   : > { %2738 = vpow2.f32 %v1311_v32 }
 0x482   : > { %v3516_v29 = vpop.eup %2716 }
 0x483   : > { %1372 = vrot.lane.b32.xlu1 %v3516_v29, %s2895_s28  ;;  %v3520_v27 = vpop.eup %2718 }
 0x484   : > { %v3522_v30 = vpop.eup %2720 }
 0x485   : > { %v3526_v35 = vpop.eup %2722  ;;  %v1323_v33 = vsel %vm842_vm1, %v3522_v30, 0.0 }
 0x486   : > { %v3535_v10 = vpop.eup %2724 }
 0x487   : > { %1433 = vrot.lane.b32.xlu1 %v3520_v27, %s2896_s24  ;;  %v3539_v13 = vpop.eup %2726 }
 0x488   : > { %v3544_v19 = vpop.eup %2728 }
 0x489   : > { %v1326_v24 = vsel %vm842_vm1, %v3544_v19, 0.0  ;;  %v3551_v50 = vpop.eup %2730 }
 0x48a   : > { %1324 = vadd.xlane.f32.xlu0 %v1323_v33  ;;  %v3553_v55 = vpop.eup %2732 }
 0x48b   : > { %1494 = vrot.lane.b32.xlu1 %v3526_v35, %s2894_s18  ;;  %v3557_v47 = vpop.eup %2734  ;;  %v1317_v51 = vsel %vm842_vm1, %v3553_v55, 0.0 }
 0x48c   : > { %v3563_v52 = vpop.eup %2736 }
 0x48d   : > { %v3588_v62 = vpop.eup %2738 }
 0x48e   : > { %v1320_v8 = vsel %vm842_vm1, %v3588_v62, 0.0 }
 0x4a0   : > { %1427 = vrot.lane.b32.xlu0 %v3535_v10, %s2896_s24 }
 0x4a4   : > { %1488 = vrot.lane.b32.xlu0 %v3539_v13, %s2894_s18 }
 0x4af   : > { %1327 = vadd.xlane.f32.xlu1 %v1326_v24  ;;  %v1153_v24 = vmul.f32 %v3500_v60, %v3299_v39 }
 0x4b1   : > { %v1536_v2 = vpack.c.bf16 %v1153_v24, %v1152_v21 }
 0x4c0   : > { %1368 = vrot.lane.b32.xlu1 %v3551_v50, %s2895_s28 }
 0x4c3   : > { %1318 = vadd.xlane.f32.xlu0 %v1317_v51 }
 0x4c4   : > { %1429 = vrot.lane.b32.xlu1 %v3557_v47, %s2896_s24 }
 0x4c8   : > { %1490 = vrot.lane.b32.xlu1 %v3563_v52, %s2894_s18  ;;  %s3898_s18 = sld [smem:[#allocation29_spill]] (!%p2417_p1) }
 0x4cc   : > { %1564 = vrot.lane.b32.xlu1 %v1542_v34, %s2896_s24 }
 0x4d0   : > { %1560 = vrot.lane.b32.xlu1 %v1540_v63, %s2896_s24 }
 0x4d4   : > { %1556 = vrot.lane.b32.xlu1 %v1538_v11, %s2896_s24 }
 0x4d5   : > { %v1371_v34 = vpop.permute.xlu0 %1370 }
 0x4d6   : > { %v1384_v4 = vsel %vm842_vm1, %v1371_v34, 0.0 }
 0x4d9   : > { %1562 = vrot.lane.b32.xlu0 %v1541_v40, %s2896_s24  ;;  %v1432_v61 = vpop.permute.xlu0 %1431 }
 0x4da   : > { %v1445_v9 = vsel %vm842_vm1, %v1432_v61, 0.0 }
 0x4dd   : > { %1558 = vrot.lane.b32.xlu0 %v1539_v6, %s2896_s24  ;;  %v1493_v37 = vpop.permute.xlu0 %1492 }
 0x4de   : > { %v1506_v40 = vsel %vm842_vm1, %v1493_v37, 0.0 }
 0x4e5   : > { %v1367_v63 = vpop.permute.xlu1 %1366 }
 0x4e6   : > { %v1378_v57 = vsel %vm842_vm1, %v1367_v63, 0.0 }
 0x4f5   : > { %v1373_v38 = vpop.permute.xlu1 %1372 }
 0x4f6   : > { %v1387_v6 = vsel %vm842_vm1, %v1373_v38, 0.0 }
 0x4f8   : > { %1321 = vadd.xlane.f32.xlu1 %v1320_v8 }
 0x4f9   : > { %v1434_v5 = vpop.permute.xlu1 %1433 }
 0x4fa   : > { %v1448_v11 = vsel %vm842_vm1, %v1434_v5, 0.0 }
 0x4fc   : > { %1507 = vadd.xlane.f32.xlu1 %v1506_v40  ;;  %1385 = vadd.xlane.f32.xlu0 %v1384_v4 }
 0x4fd   : > { %v1495_v56 = vpop.permute.xlu1 %1494 }
 0x4fe   : > { %v1509_v58 = vsel %vm842_vm1, %v1495_v56, 0.0 }
 0x500   : > { %1388 = vadd.xlane.f32.xlu1 %v1387_v6  ;;  %1446 = vadd.xlane.f32.xlu0 %v1445_v9 }
 0x504   : > { %1449 = vadd.xlane.f32.xlu1 %v1448_v11  ;;  %1379 = vadd.xlane.f32.xlu0 %v1378_v57 }
 0x508   : > { %1510 = vadd.xlane.f32.xlu1 %v1509_v58 }
 0x513   : > { %v1325_v59 = vpop.xlane.xlu0 %1324 }
 0x514   : > { %2740 = vrcp.f32 %v1325_v59 }
 0x517   : > { %v1428_v28 = vpop.permute.xlu0 %1427 }
 0x518   : > { %v1439_v33 = vsel %vm842_vm1, %v1428_v28, 0.0 }
 0x519   : > { %1440 = vadd.xlane.f32.xlu0 %v1439_v33 }
 0x51b   : > { %v1489_v36 = vpop.permute.xlu0 %1488 }
 0x51c   : > { %v1500_v41 = vsel %vm842_vm1, %v1489_v36, 0.0 }
 0x51d   : > { %1501 = vadd.xlane.f32.xlu0 %v1500_v41  ;;  %v1628_v41 = vld [vmem:[%s3100_s22 + $0x18] sm:$0xff] }
 0x538   : > { %v1328_v43 = vpop.xlane.xlu1 %1327 }
 0x53c   : > { %v1369_v0 = vpop.permute.xlu1 %1368 }
 0x53d   : > { %v1381_v1 = vsel %vm842_vm1, %v1369_v0, 0.0 }
 0x53e   : > { %1382 = vadd.xlane.f32.xlu0 %v1381_v1 }
 0x540   : > { %v1430_v3 = vpop.permute.xlu1 %1429 }
 0x541   : > { %v1442_v7 = vsel %vm842_vm1, %v1430_v3, 0.0 }
 0x542   : > { %1443 = vadd.xlane.f32.xlu1 %v1442_v7 }
 0x544   : > { %v1491_v12 = vpop.permute.xlu1 %1490 }
 0x545   : > { %v1503_v17 = vsel %vm842_vm1, %v1491_v12, 0.0 }
 0x546   : > { %1504 = vadd.xlane.f32.xlu1 %v1503_v17 }
 0x548   : > { %v1565_v18 = vpop.permute.xlu1 %1564 }
 0x549   : > { %2532 = vmatprep.subr.bf16.mxu0 %v1565_v18 }
 0x54a   : > { %2533 = vmatpush3.bf16.msra.mxu0 %v1565_v18 }
 0x54c   : > { %v1319_v45 = vpop.xlane.xlu0 %1318  ;;  %v1561_v26 = vpop.permute.xlu1 %1560 }
 0x550   : > { %v1563_v22 = vpop.permute.xlu0 %1562  ;;  %v1557_v42 = vpop.permute.xlu1 %1556 }
 0x551   : > { %2534 = vmatprep.subr.bf16.mxu0 %v1563_v22 }
 0x552   : > { %2535 = vmatpush3.bf16.msra.mxu0 %v1563_v22 }
 0x553   : > { %2536 = vmatprep.subr.bf16.mxu0 %v1561_v26 }
 0x554   : > { %1554 = vrot.lane.b32.xlu0 %v1537_v16, %s2896_s24  ;;  %v1559_v46 = vpop.permute.xlu0 %1558  ;;  %v2741_v16 = vpop.eup %2740 }
 0x555   : > { %v1335_v8 = vmul.f32 %v2741_v16, %v3522_v30 }
 0x556   : > { %2537 = vmatpush3.bf16.msra.mxu0 %v1561_v26 }
 0x557   : > { %1552 = vrot.lane.b32.xlu1 %v1536_v2, %s2896_s24  ;;  %2538 = vmatprep.subr.bf16.mxu0 %v1559_v46 }
 0x55a   : > { %2539 = vmatpush3.bf16.msra.mxu0 %v1559_v46 }
 0x55b   : > { %2540 = vmatprep.subr.bf16.mxu0 %v1557_v42 }
 0x55e   : > { %2541 = vmatpush3.bf16.msra.mxu0 %v1557_v42 }
 0x581   : > { %v1322_v20 = vpop.xlane.xlu1 %1321 }
 0x585   : > { %v1508_v39 = vpop.xlane.xlu1 %1507  ;;  %v1386_v60 = vpop.xlane.xlu0 %1385 }
 0x586   : > { %2742 = vrcp.f32 %v1386_v60 }
 0x589   : > { %v1389_v48 = vpop.xlane.xlu1 %1388  ;;  %v1447_v49 = vpop.xlane.xlu0 %1446 }
 0x58a   : > { %2744 = vrcp.f32 %v1447_v49 }
 0x58b   : > { %2746 = vrcp.f32 %v1389_v48 }
 0x58c   : > { %2748 = vrcp.f32 %v1328_v43 }
 0x58d   : > { %v1450_v14 = vpop.xlane.xlu1 %1449 }
 0x58e   : > { %2750 = vrcp.f32 %v1450_v14  ;;  %v2404_v14 = vld [vmem:[%s3892_s29] ss:$0 sm:$0xff] }
 0x58f   : > { %2752 = vrcp.f32 %v1508_v39 }
 0x591   : > { %v1511_v15 = vpop.xlane.xlu1 %1510 }
 0x592   : > { %2754 = vrcp.f32 %v1511_v15 }
 0x593   : > { %v2743_v51 = vpop.eup %2742  ;;  %2756 = vrcp.f32 %v1319_v45 }
 0x594   : > { %v1396_v34 = vmul.f32 %v2743_v51, %v3494_v23  ;;  %2758 = vrcp.f32 %v1322_v20  ;;  %v1625_v20 = vld [vmem:[%s3100_s22] sm:$0xff] }
 0x596   : > { %v1522_v5 = vsel %vm842_vm1, %v1335_v8, %v1396_v34 }
 0x597   : > { %v2745_v54 = vpop.eup %2744 }
 0x598   : > { %v2747_v31 = vpop.eup %2746  ;;  %v1457_v63 = vmul.f32 %v2745_v54, %v3498_v25  ;;  %v2788_v54 = vld [vmem:[#allocation2 + $0x8] sm:$0xff] }
 0x599   : > { %v2749_v32 = vpop.eup %2748  ;;  %v1397_v37 = vmul.f32 %v2747_v31, %v3516_v29 }
 0x59a   : > { %v1336_v4 = vmul.f32 %v2749_v32, %v3544_v19  ;;  %v1527_v9 = vsel %vm1524_vm5, %v1522_v5, %v1457_v63  ;;  %v1380_v19 = vpop.xlane.xlu0 %1379  ;;  %v2790_v5 = vld [vmem:[#allocation2 + $0x10] sm:$0xff] }
 0x59b   : > { %v2751_v61 = vpop.eup %2750  ;;  %2760 = vrcp.f32 %v1380_v19 }
 0x59c   : > { %v2753_v38 = vpop.eup %2752  ;;  %v1458_v40 = vmul.f32 %v2751_v61, %v3520_v27  ;;  %v1523_v11 = vsel %vm842_vm1, %v1336_v4, %v1397_v37  ;;  %v2789_v61 = vld [vmem:[#allocation2] sm:$0xff] }
 0x59d   : > { %v1518_v23 = vmul.f32 %v2753_v38, %v3504_v44 }
 0x59e   : > { %v1528_v30 = vsel %vm1524_vm5, %v1523_v11, %v1458_v40 }
 0x59f   : > { %v2755_v6 = vpop.eup %2754  ;;  %v1532_v29 = vsel %vm1529_vm6, %v1527_v9, %v1518_v23  ;;  %v2791_v9 = vld [vmem:[#allocation2 + $0x18] sm:$0xff] }
 0x5a0   : > { %v1519_v25 = vmul.f32 %v2755_v6, %v3526_v35  ;;  %v2757_v33 = vpop.eup %2756 }
 0x5a1   : > { %v2759_v43 = vpop.eup %2758  ;;  %v1333_v22 = vmul.f32 %v2757_v33, %v3553_v55 }
 0x5a2   : > { %v1533_v27 = vsel %vm1529_vm6, %v1528_v30, %v1519_v25  ;;  %v1441_v57 = vpop.xlane.xlu0 %1440  ;;  %v1334_v24 = vmul.f32 %v2759_v43, %v3588_v62 }
 0x5a3   : > { %v1535_v56 = vpack.c.bf16 %v1533_v27, %v1532_v29  ;;  %2762 = vrcp.f32 %v1441_v57 }
 0x5a6   : > { %v1502_v58 = vpop.xlane.xlu0 %1501 }
 0x5a8   : > { %v2761_v0 = vpop.eup %2760 }
 0x5a9   : > { %v1394_v17 = vmul.f32 %v2761_v0, %v3511_v53 }
 0x5ab   : > { %v1520_v42 = vsel %vm842_vm1, %v1333_v22, %v1394_v17  ;;  %v1814_v17 = vld [vmem:[%s3117_s0 + $0x18] sm:$0xff] }
 0x5b0   : > { %v2763_v1 = vpop.eup %2762 }
 0x5b1   : > { %v1455_v45 = vmul.f32 %v2763_v1, %v3535_v10 }
 0x5b3   : > { %v1525_v10 = vsel %vm1524_vm5, %v1520_v42, %v1455_v45  ;;  %v1812_v45 = vld [vmem:[%s3117_s0 + $0x8] sm:$0xff] }
 0x5c7   : > { %v1383_v59 = vpop.xlane.xlu0 %1382 }
 0x5c8   : > { %2764 = vrcp.f32 %v1383_v59 }
 0x5c9   : > { %2766 = vrcp.f32 %v1502_v58 }
 0x5cb   : > { %v1444_v44 = vpop.xlane.xlu1 %1443  ;;  %v1555_v35 = vpop.permute.xlu0 %1554 }
 0x5cc   : > { %2768 = vrcp.f32 %v1444_v44  ;;  %2542 = vmatprep.subr.bf16.mxu0 %v1555_v35 }
 0x5cd   : > { %2543 = vmatpush3.bf16.msra.mxu0 %v1555_v35 }
 0x5cf   : > { %v1505_v28 = vpop.xlane.xlu1 %1504 }
 0x5d0   : > { %2770 = vrcp.f32 %v1505_v28 }
 0x5d3   : > { %v1553_v36 = vpop.permute.xlu1 %1552 }
 0x5d4   : > { %2544 = vmatprep.subr.bf16.mxu0 %v1553_v36 }
 0x5d5   : > { %2545 = vmatpush3.bf16.msra.mxu0 %v1553_v36  ;;  %v2765_v3 = vpop.eup %2764 }
 0x5d6   : > { %2550 = vmatprep.subr.mxu0 %v1628_v41  ;;  %v2767_v7 = vpop.eup %2766  ;;  %v1395_v18 = vmul.f32 %v2765_v3, %v3551_v50 }
 0x5d7   : > { %v1516_v26 = vmul.f32 %v2767_v7, %v3539_v13  ;;  %v1627_v13 = vld [vmem:[%s3100_s22 + $0x10] sm:$0xff] }
 0x5d8   : > { %v1521_v53 = vsel %vm842_vm1, %v1334_v24, %v1395_v18  ;;  %v1813_v18 = vld [vmem:[%s3117_s0 + $0x10] sm:$0xff] }
 0x5d9   : > { %v2769_v12 = vpop.eup %2768 }
 0x5da   : > { %v1456_v21 = vmul.f32 %v2769_v12, %v3557_v47  ;;  %v1530_v47 = vsel %vm1529_vm6, %v1525_v10, %v1516_v26 }
 0x5dc   : > { %v1526_v50 = vsel %vm1524_vm5, %v1521_v53, %v1456_v21  ;;  %v1811_v21 = vld [vmem:[%s3117_s0] sm:$0xff] }
 0x5dd   : > { %v2771_v2 = vpop.eup %2770 }
 0x5de   : > { %v1517_v46 = vmul.f32 %v2771_v2, %v3563_v52  ;;  %v1626_v52 = vld [vmem:[%s3100_s22 + $0x8] sm:$0xff] }
 0x5e0   : > { %v1531_v55 = vsel %vm1529_vm6, %v1526_v50, %v1517_v46 }
 0x5e1   : > { %v1534_v62 = vpack.c.bf16 %v1531_v55, %v1530_v47 }
 0x5e3   : > { %2546 = vmatprep.mubr.bf16.mxu0 %v1534_v62 }
 0x5e4   : > { %2547 = vmatmul.mubr.bf16.vlgmr.msra.gmra.mxu0 %v1535_v56 }
 0x5e5   : > { %2551 = vmatpush3.msra.mxu0 %v1628_v41 }
 0x5e6   : > { %2552 = vmatprep.subr.mxu0 %v1627_v13 }
 0x5e7   : > { %2553 = vmatpush3.msra.mxu0 %v1627_v13 }
 0x5e8   : > { %2554 = vmatprep.subr.mxu0 %v1626_v52 }
 0x5e9   : > { %2555 = vmatpush3.msra.mxu0 %v1626_v52 }
 0x5ea   : > { %2556 = vmatprep.subr.mxu0 %v1625_v20 }
 0x5eb   : > { %2557 = vmatpush3.msra.mxu0 %v1625_v20  ;;  %v2409_v20 = vld [vmem:[%s3893_s20] ss:$0 sm:$0xff] }
 0x5ec   : > { %2564 = vmatprep.subr.mxu0 %v1814_v17 }
 0x6a4   : > { %v2548_v39 = vpop.f32.mrf.mxu0 }
 0x6a6   : > { %v1610_v60 = vpop.f32.mrf.mxu0 }
 0x6a7   : > { %2558 = vmatprep.mubr.msk.f32.mxu0 %vm842_vm1, %v1610_v60 }
 0x6a8   : > { %v2549_v48 = vpop.f32.mrf.mxu0 }
 0x6aa   : > { %v1613_v49 = vpop.f32.mrf.mxu0 }
 0x6ab   : > { %2559 = vmatmul.mubr.msk.f32.vlgmr.msra.gmra.mxu0 %vm842_vm1, %v1613_v49  ;;  %v2410_v49 = vld [vmem:[%s3894_s17] ss:$0 sm:$0xff] }
 0x6ac   : > { %2561 = vmatprep.mubr.msk.f32.mxu0 %vm842_vm1, %v2548_v39  ;;  %2565 = vmatpush3.msra.mxu0 %v1814_v17 }
 0x6ad   : > { %2566 = vmatprep.subr.mxu0 %v1813_v18 }
 0x6ae   : > { %2567 = vmatpush3.msra.mxu0 %v1813_v18 }
 0x6af   : > { %2562 = vmatmul.mubr.msk.f32.gmra.mxu0 %vm842_vm1, %v2549_v48  ;;  %2568 = vmatprep.subr.mxu0 %v1812_v45 }
 0x6b0   : > { %2569 = vmatpush3.msra.mxu0 %v1812_v45 }
 0x6b1   : > { %2570 = vmatprep.subr.mxu0 %v1811_v21 }
 0x6b2   : > { %2571 = vmatpush3.msra.mxu0 %v1811_v21 }
 0x76b   : > { %v2560_v15 = vpop.f32.mrf.mxu0 }
 0x76c   : > { %v1720_v16 = vadd.f32 %v2560_v15, %v2404_v14 }
 0x76d   : > { %v1714_v51 = vpop.f32.mrf.mxu0 }
 0x76e   : > { %v3654_v31 = vadd.f32 %v2788_v54, %v1720_v16  ;;  %v1715_v32 = vadd.f32 %v2404_v14, %v1714_v51 }
 0x76f   : > { %v2563_v34 = vpop.f32.mrf.mxu0 }
 0x770   : > { %v3656_v63 = vadd.f32 %v2789_v61, %v1715_v32  ;;  %v1742_v8 = vsel %vm842_vm1, %v3654_v31, 0.0  ;;  %v1730_v38 = vadd.f32 %v2563_v34, %v2404_v14 }
 0x771   : > { %1743 = vadd.xlane.f32.xlu1 %v1742_v8  ;;  %v1724_v37 = vpop.f32.mrf.mxu0 }
 0x772   : > { %v1725_v40 = vadd.f32 %v2404_v14, %v1724_v37  ;;  %v1739_v4 = vsel %vm842_vm1, %v3656_v63, 0.0  ;;  %v3664_v23 = vadd.f32 %v2791_v9, %v1730_v38  ;;  %v1967_v9 = vld [vmem:[%s3127_s9 + $0x60] sm:$0xff] }
 0x773   : > { %1740 = vadd.xlane.f32.xlu0 %v1739_v4  ;;  %v1969_v4 = vld [vmem:[%s3127_s9 + $0x70] sm:$0xff] }
 0x774   : > { %v3662_v6 = vadd.f32 %v2790_v5, %v1725_v40  ;;  %v1748_v11 = vsel %vm842_vm1, %v3664_v23, 0.0  ;;  %v1970_v40 = vld [vmem:[%s3127_s9 + $0x78] sm:$0xff]  ;;  %v1968_v5 = vld [vmem:[%s3127_s9 + $0x68] sm:$0xff] }
 0x775   : > { %2578 = vmatprep.subr.mxu0 %v1970_v40 }
 0x776   : > { %v1745_v25 = vsel %vm842_vm1, %v3662_v6, 0.0 }
 0x777   : > { %1746 = vadd.xlane.f32.xlu0 %v1745_v25  ;;  %v1966_v25 = vld [vmem:[%s3127_s9 + $0x58] sm:$0xff] }
 0x77b   : > { %1749 = vadd.xlane.f32.xlu0 %v1748_v11  ;;  %v1965_v11 = vld [vmem:[%s3127_s9 + $0x50] sm:$0xff] }
 0x7fa   : > { %v1744_v30 = vpop.xlane.xlu1 %1743 }
 0x7fb   : > { %v1752_v29 = vmul.f32 0.03125, %v1744_v30  ;;  %v1964_v30 = vld [vmem:[%s3127_s9 + $0x48] sm:$0xff] }
 0x7fc   : > { %v1741_v27 = vpop.xlane.xlu0 %1740 }
 0x7fd   : > { %v1756_v56 = vsub.f32 %v3654_v31, %v1752_v29  ;;  %v1751_v19 = vmul.f32 0.03125, %v1741_v27  ;;  %v1963_v29 = vld [vmem:[%s3127_s9 + $0x40] sm:$0xff]  ;;  %v1962_v27 = vld [vmem:[%s3127_s9 + $0x38] sm:$0xff] }
 0x7ff   : > { %v1755_v57 = vsub.f32 %v3656_v63, %v1751_v19  ;;  %v1760_v58 = vmul.f32 %v1756_v56, %v1756_v56  ;;  %v1960_v19 = vld [vmem:[%s3127_s9 + $0x28] sm:$0xff] }
 0x800   : > { %v1747_v59 = vpop.xlane.xlu0 %1746 }
 0x801   : > { %v1753_v44 = vmul.f32 0.03125, %v1747_v59  ;;  %v1766_v35 = vsel %vm842_vm1, %v1760_v58, 0.0  ;;  %v1759_v28 = vmul.f32 %v1755_v57, %v1755_v57  ;;  %v1958_v58 = vld [vmem:[%s3127_s9 + $0x18] sm:$0xff]  ;;  %v1957_v59 = vld [vmem:[%s3127_s9 + $0x10] sm:$0xff] }
 0x802   : > { %1767 = vadd.xlane.f32.xlu1 %v1766_v35  ;;  %v1955_v35 = vld [vmem:[%s3127_s9] sm:$0xff] }
 0x803   : > { %v1757_v33 = vsub.f32 %v3662_v6, %v1753_v44  ;;  %v1763_v36 = vsel %vm842_vm1, %v1759_v28, 0.0  ;;  %v1956_v44 = vld [vmem:[%s3127_s9 + $0x8] sm:$0xff]  ;;  %v2411_v28 = vld [vmem:[%s789_s6] ss:$0 sm:$0xff] }
 0x804   : > { %1764 = vadd.xlane.f32.xlu0 %v1763_v36  ;;  %v1750_v41 = vpop.xlane.xlu0 %1749 }
 0x805   : > { %v1754_v43 = vmul.f32 0.03125, %v1750_v41  ;;  %v1761_v0 = vmul.f32 %v1757_v33, %v1757_v33 }
 0x807   : > { %v1758_v1 = vsub.f32 %v3664_v23, %v1754_v43  ;;  %v1769_v3 = vsel %vm842_vm1, %v1761_v0, 0.0 }
 0x808   : > { %1770 = vadd.xlane.f32.xlu0 %v1769_v3 }
 0x809   : > { %v1762_v7 = vmul.f32 %v1758_v1, %v1758_v1 }
 0x80b   : > { %v1772_v12 = vsel %vm842_vm1, %v1762_v7, 0.0 }
 0x80c   : > { %1773 = vadd.xlane.f32.xlu1 %v1772_v12 }
 0x88b   : > { %v1768_v22 = vpop.xlane.xlu1 %1767 }
 0x88c   : > { %v1776_v24 = vmul.f32 0.03125, %v1768_v22 }
 0x88d   : > { %v1765_v26 = vpop.xlane.xlu0 %1764 }
 0x88e   : > { %v1780_v2 = vadd.f32 1e-05, %v1776_v24  ;;  %v1775_v46 = vmul.f32 0.03125, %v1765_v26 }
 0x890   : > { %2772 = vrsqrt.f32 %v1780_v2  ;;  %v1779_v42 = vadd.f32 1e-05, %v1775_v46 }
 0x891   : > { %v1771_v53 = vpop.xlane.xlu0 %1770 }
 0x892   : > { %2774 = vrsqrt.f32 %v1779_v42  ;;  %v1777_v10 = vmul.f32 0.03125, %v1771_v53 }
 0x894   : > { %v1781_v50 = vadd.f32 1e-05, %v1777_v10 }
 0x895   : > { %v1774_v47 = vpop.xlane.xlu1 %1773 }
 0x896   : > { %2776 = vrsqrt.f32 %v1781_v50  ;;  %v1778_v55 = vmul.f32 0.03125, %v1774_v47 }
 0x898   : > { %v1782_v62 = vadd.f32 1e-05, %v1778_v55 }
 0x89a   : > { %2778 = vrsqrt.f32 %v1782_v62 }
 0x89d   : > { %v2773_v13 = vpop.eup %2772 }
 0x89e   : > { %v1788_v52 = vmul.f32 %v2773_v13, %v1756_v56  ;;  %v1961_v56 = vld [vmem:[%s3127_s9 + $0x30] sm:$0xff] }
 0x89f   : > { %v2775_v39 = vpop.eup %2774 }
 0x8a0   : > { %v1787_v60 = vmul.f32 %v2775_v39, %v1755_v57  ;;  %v1798_v48 = vmul.f32 %v2409_v20, %v1788_v52  ;;  %v1959_v57 = vld [vmem:[%s3127_s9 + $0x20] sm:$0xff] }
 0x8a2   : > { %v1797_v14 = vmul.f32 %v2409_v20, %v1787_v60  ;;  %v1808_v54 = vadd.f32 %v2410_v49, %v1798_v48 }
 0x8a3   : > { %v2777_v15 = vpop.eup %2776 }
 0x8a4   : > { %v1807_v16 = vadd.f32 %v2410_v49, %v1797_v14  ;;  %v1789_v51 = vmul.f32 %v2777_v15, %v1757_v33 }
 0x8a6   : > { %2572 = vmatprep.mubr.msk.f32.mxu0 %vm842_vm1, %v1807_v16  ;;  %v1799_v32 = vmul.f32 %v2409_v20, %v1789_v51 }
 0x8a7   : > { %v2779_v34 = vpop.eup %2778  ;;  %2573 = vmatmul.mubr.msk.f32.vlgmr.msra.gmra.mxu0 %vm842_vm1, %v1808_v54 }
 0x8a8   : > { %v1809_v61 = vadd.f32 %v2410_v49, %v1799_v32  ;;  %v1790_v8 = vmul.f32 %v2779_v34, %v1758_v1  ;;  %2579 = vmatpush3.msra.mxu0 %v1970_v40 }
 0x8a9   : > { %2580 = vmatprep.subr.mxu0 %v1969_v4 }
 0x8aa   : > { %2575 = vmatprep.mubr.msk.f32.mxu0 %vm842_vm1, %v1809_v61  ;;  %v1800_v37 = vmul.f32 %v2409_v20, %v1790_v8  ;;  %2581 = vmatpush3.msra.mxu0 %v1969_v4 }
 0x8ab   : > { %2582 = vmatprep.subr.mxu0 %v1968_v5 }
 0x8ac   : > { %v1810_v38 = vadd.f32 %v2410_v49, %v1800_v37  ;;  %2583 = vmatpush3.msra.mxu0 %v1968_v5  ;;  %v2416_v5 = vld [vmem:[%s797_s15] ss:$0 sm:$0xff] }
 0x8ad   : > { %2584 = vmatprep.subr.mxu0 %v1967_v9 }
 0x8ae   : > { %2576 = vmatmul.mubr.msk.f32.gmra.mxu0 %vm842_vm1, %v1810_v38 }
 0x8af   : > { %2585 = vmatpush3.msra.mxu0 %v1967_v9 }
 0x8b0   : > { %2586 = vmatprep.subr.mxu0 %v1966_v25 }
 0x8b1   : > { %2587 = vmatpush3.msra.mxu0 %v1966_v25 }
 0x8b2   : > { %2588 = vmatprep.subr.mxu0 %v1965_v11 }
 0x8b3   : > { %2589 = vmatpush3.msra.mxu0 %v1965_v11 }
 0x8b4   : > { %2590 = vmatprep.subr.mxu0 %v1964_v30 }
 0x8b5   : > { %2591 = vmatpush3.msra.mxu0 %v1964_v30 }
 0x8b6   : > { %2592 = vmatprep.subr.mxu0 %v1963_v29 }
 0x8b7   : > { %2593 = vmatpush3.msra.mxu0 %v1963_v29 }
 0x8b8   : > { %2594 = vmatprep.subr.mxu0 %v1962_v27 }
 0x8b9   : > { %2595 = vmatpush3.msra.mxu0 %v1962_v27 }
 0x8ba   : > { %2596 = vmatprep.subr.mxu0 %v1961_v56 }
 0x8bb   : > { %2597 = vmatpush3.msra.mxu0 %v1961_v56 }
 0x8bc   : > { %2598 = vmatprep.subr.mxu0 %v1960_v19 }
 0x8bd   : > { %2599 = vmatpush3.msra.mxu0 %v1960_v19 }
 0x8be   : > { %2600 = vmatprep.subr.mxu0 %v1959_v57 }
 0x8bf   : > { %2601 = vmatpush3.msra.mxu0 %v1959_v57 }
 0x8c0   : > { %2602 = vmatprep.subr.mxu0 %v1958_v58 }
 0x8c1   : > { %2603 = vmatpush3.msra.mxu0 %v1958_v58 }
 0x8c2   : > { %2604 = vmatprep.subr.mxu0 %v1957_v59 }
 0x8c3   : > { %2605 = vmatpush3.msra.mxu0 %v1957_v59 }
 0x8c4   : > { %2606 = vmatprep.subr.mxu0 %v1956_v44 }
 0x8c5   : > { %2607 = vmatpush3.msra.mxu0 %v1956_v44 }
 0x8c6   : > { %2608 = vmatprep.subr.mxu0 %v1955_v35 }
 0x8c7   : > { %2609 = vmatpush3.msra.mxu0 %v1955_v35 }
 0x967   : > { %v2574_v33 = vpop.f32.mrf.mxu0 }
 0x968   : > { %v1906_v36 = vadd.f32 %v2574_v33, %v2411_v28 }
 0x969   : > { %v1900_v41 = vpop.f32.mrf.mxu0 }
 0x96a   : > { %v1924_v43 = vmul.f32 0.044715, %v1906_v36  ;;  %v1901_v0 = vadd.f32 %v2411_v28, %v1900_v41  ;;  %v1920_v15 = vmul.f32 0.5, %v1906_v36 }
 0x96c   : > { %v1928_v1 = vmul.f32 %v1924_v43, %v1906_v36  ;;  %v1923_v3 = vmul.f32 0.044715, %v1901_v0  ;;  %v1919_v49 = vmul.f32 0.5, %v1901_v0 }
 0x96e   : > { %v1932_v7 = vmul.f32 %v1928_v1, %v1906_v36  ;;  %v1927_v12 = vmul.f32 %v1923_v3, %v1901_v0  ;;  %v2577_v17 = vpop.f32.mrf.mxu0 }
 0x96f   : > { %v1916_v18 = vadd.f32 %v2577_v17, %v2411_v28 }
 0x970   : > { %v1936_v45 = vadd.f32 %v1932_v7, %v1906_v36  ;;  %v1910_v21 = vpop.f32.mrf.mxu0  ;;  %v1931_v22 = vmul.f32 %v1927_v12, %v1901_v0 }
 0x971   : > { %v1926_v24 = vmul.f32 0.044715, %v1916_v18  ;;  %v1911_v26 = vadd.f32 %v2411_v28, %v1910_v21  ;;  %v1922_v37 = vmul.f32 0.5, %v1916_v18 }
 0x972   : > { %v1940_v2 = vmul.f32 0.7978846, %v1936_v45  ;;  %v1935_v46 = vadd.f32 %v1931_v22, %v1901_v0 }
 0x973   : > { %v1930_v42 = vmul.f32 %v1926_v24, %v1916_v18  ;;  %v1925_v53 = vmul.f32 0.044715, %v1911_v26  ;;  %v1921_v61 = vmul.f32 0.5, %v1911_v26 }
 0x974   : > { %2780 = vtanh.f32 %v1940_v2  ;;  %v1939_v10 = vmul.f32 0.7978846, %v1935_v46 }
 0x975   : > { %v1929_v50 = vmul.f32 %v1925_v53, %v1911_v26  ;;  %v1934_v47 = vmul.f32 %v1930_v42, %v1916_v18 }
 0x976   : > { %2782 = vtanh.f32 %v1939_v10 }
 0x977   : > { %v1933_v55 = vmul.f32 %v1929_v50, %v1911_v26  ;;  %v1938_v62 = vadd.f32 %v1934_v47, %v1916_v18 }
 0x979   : > { %v1937_v13 = vadd.f32 %v1933_v55, %v1911_v26  ;;  %v1942_v52 = vmul.f32 0.7978846, %v1938_v62 }
 0x97b   : > { %v1941_v20 = vmul.f32 0.7978846, %v1937_v13  ;;  %2784 = vtanh.f32 %v1942_v52 }
 0x97d   : > { %2786 = vtanh.f32 %v1941_v20 }
 0x981   : > { %v2781_v39 = vpop.eup %2780 }
 0x982   : > { %v1948_v48 = vadd.f32 1.0, %v2781_v39 }
 0x983   : > { %v2783_v60 = vpop.eup %2782 }
 0x984   : > { %v1947_v14 = vadd.f32 1.0, %v2783_v60  ;;  %v1952_v51 = vmul.f32 %v1948_v48, %v1920_v15 }
 0x986   : > { %v1951_v16 = vmul.f32 %v1947_v14, %v1919_v49 }
 0x988   : > { %v2785_v54 = vpop.eup %2784  ;;  %2610 = vmatprep.mubr.f32.mxu0 %v1951_v16 }
 0x989   : > { %2611 = vmatmul.mubr.f32.vlgmr.msra.gmra.mxu0 %v1952_v51  ;;  %v1950_v34 = vadd.f32 1.0, %v2785_v54 }
 0x98a   : > { %v2787_v32 = vpop.eup %2786 }
 0x98b   : > { %v1949_v8 = vadd.f32 1.0, %v2787_v32  ;;  %v1954_v40 = vmul.f32 %v1950_v34, %v1922_v37 }
 0x98d   : > { %v1953_v38 = vmul.f32 %v1949_v8, %v1921_v61 }
 0x98f   : > { %2613 = vmatprep.mubr.f32.mxu0 %v1953_v38 }
 0x990   : > { %2614 = vmatmul.mubr.f32.gmra.mxu0 %v1954_v40 }
 0xa49   : > { %v2612_v4 = vpop.f32.mrf.mxu0 }
 0xa4a   : > { %v2057_v9 = vadd.f32 %v2612_v4, %v3654_v31 }
 0xa4b   : > { %v2037_v25 = vpop.f32.mrf.mxu0 }
 0xa4c   : > { %v2068_v11 = vadd.f32 %v2416_v5, %v2057_v9  ;;  %v2056_v30 = vadd.f32 %v2037_v25, %v3656_v63 }
 0xa4e   : > { %2072 = vst.msk [vmem:[#allocation2 + $0x8] sm:$0xff] %vm842_vm1, %v2068_v11  ;;  %v2067_v29 = vadd.f32 %v2416_v5, %v2056_v30 }
 0xa50   : > { %2071 = vst.msk [vmem:[#allocation2] sm:$0xff] %vm842_vm1, %v2067_v29  ;;  %v2615_v27 = vpop.f32.mrf.mxu0 }
 0xa51   : > { %v2059_v56 = vadd.f32 %v2615_v27, %v3664_v23 }
 0xa52   : > { %v2047_v19 = vpop.f32.mrf.mxu0 }
 0xa53   : > { %v2070_v57 = vadd.f32 %v2416_v5, %v2059_v56  ;;  %v2058_v58 = vadd.f32 %v2047_v19, %v3662_v6  ;;  %2078 = sbr.rel (%p2417_p1) target bundleno = 2965 (0xb95), region = 100 }
 0xa55   : > { %2074 = vst.msk [vmem:[#allocation2 + $0x18] sm:$0xff] %vm842_vm1, %v2070_v57  ;;  %v2069_v59 = vadd.f32 %v2416_v5, %v2058_v58 }
 0xa57   : > { %2073 = vst.msk [vmem:[#allocation2 + $0x10] sm:$0xff] %vm842_vm1, %v2069_v59 }
 0xa58   : > { %v2081_v31 = vsel %vm842_vm1, %v2067_v29, 0.0  ;;  %v2087_v63 = vsel %vm842_vm1, %v2069_v59, 0.0  ;;  %v2084_v23 = vsel %vm842_vm1, %v2068_v11, 0.0  ;;  %v2090_v44 = vsel %vm842_vm1, %v2070_v57, 0.0  ;;  %v2418_v48 = vld [vmem:[%s3897_s2] ss:$0 sm:$0xff] }
 0xa59   : > { %2082 = vadd.xlane.f32.xlu0 %v2081_v31  ;;  %2088 = vadd.xlane.f32.xlu1 %v2087_v63  ;;  %v2419_v14 = vld [vmem:[%s3898_s18] ss:$0 sm:$0xff] }
 0xa5d   : > { %2085 = vadd.xlane.f32.xlu0 %v2084_v23  ;;  %2091 = vadd.xlane.f32.xlu1 %v2090_v44 }
 0xae2   : > { %v2083_v6 = vpop.xlane.xlu0 %2082  ;;  %v2089_v35 = vpop.xlane.xlu1 %2088 }
 0xae3   : > { %v2093_v28 = vmul.f32 0.03125, %v2083_v6  ;;  %v2095_v33 = vmul.f32 0.03125, %v2089_v35 }
 0xae5   : > { %v2097_v36 = vsub.f32 %v2067_v29, %v2093_v28  ;;  %v2099_v41 = vsub.f32 %v2069_v59, %v2095_v33 }
 0xae6   : > { %v2086_v43 = vpop.xlane.xlu0 %2085  ;;  %v2092_v0 = vpop.xlane.xlu1 %2091 }
 0xae7   : > { %v2094_v1 = vmul.f32 0.03125, %v2086_v43  ;;  %v2096_v3 = vmul.f32 0.03125, %v2092_v0  ;;  %v2101_v7 = vmul.f32 %v2097_v36, %v2097_v36  ;;  %v2103_v12 = vmul.f32 %v2099_v41, %v2099_v41 }
 0xae9   : > { %v2098_v17 = vsub.f32 %v2068_v11, %v2094_v1  ;;  %v2100_v18 = vsub.f32 %v2070_v57, %v2096_v3  ;;  %v2105_v45 = vsel %vm842_vm1, %v2101_v7, 0.0  ;;  %v2111_v21 = vsel %vm842_vm1, %v2103_v12, 0.0 }
 0xaea   : > { %2106 = vadd.xlane.f32.xlu0 %v2105_v45 }
 0xaeb   : > { %v2102_v22 = vmul.f32 %v2098_v17, %v2098_v17  ;;  %v2104_v24 = vmul.f32 %v2100_v18, %v2100_v18 }
 0xaed   : > { %v2108_v26 = vsel %vm842_vm1, %v2102_v22, 0.0  ;;  %v2114_v2 = vsel %vm842_vm1, %v2104_v24, 0.0 }
 0xaee   : > { %2112 = vadd.xlane.f32.xlu0 %v2111_v21  ;;  %2109 = vadd.xlane.f32.xlu1 %v2108_v26 }
 0xaf2   : > { %2115 = vadd.xlane.f32.xlu1 %v2114_v2 }
 0xb73   : > { %v2107_v46 = vpop.xlane.xlu0 %2106 }
 0xb74   : > { %v2117_v42 = vmul.f32 0.03125, %v2107_v46 }
 0xb76   : > { %v2121_v53 = vadd.f32 1e-05, %v2117_v42 }
 0xb77   : > { %v2110_v10 = vpop.xlane.xlu1 %2109  ;;  %v2113_v50 = vpop.xlane.xlu0 %2112 }
 0xb78   : > { %2792 = vrsqrt.f32 %v2121_v53  ;;  %v2118_v47 = vmul.f32 0.03125, %v2110_v10  ;;  %v2119_v55 = vmul.f32 0.03125, %v2113_v50 }
 0xb7a   : > { %v2122_v62 = vadd.f32 1e-05, %v2118_v47  ;;  %v2123_v13 = vadd.f32 1e-05, %v2119_v55 }
 0xb7b   : > { %v2116_v52 = vpop.xlane.xlu1 %2115 }
 0xb7c   : > { %2794 = vrsqrt.f32 %v2122_v62  ;;  %v2120_v20 = vmul.f32 0.03125, %v2116_v52 }
 0xb7d   : > { %2796 = vrsqrt.f32 %v2123_v13 }
 0xb7e   : > { %v2124_v39 = vadd.f32 1e-05, %v2120_v20 }
 0xb80   : > { %2798 = vrsqrt.f32 %v2124_v39 }
 0xb85   : > { %v2793_v60 = vpop.eup %2792 }
 0xb86   : > { %v2129_v49 = vmul.f32 %v2793_v60, %v2097_v36 }
 0xb88   : > { %v2139_v15 = vmul.f32 %v2418_v48, %v2129_v49 }
 0xb89   : > { %v2795_v16 = vpop.eup %2794 }
 0xb8a   : > { %v2797_v51 = vpop.eup %2796  ;;  %v2149_v54 = vadd.f32 %v2419_v14, %v2139_v15  ;;  %v2130_v32 = vmul.f32 %v2795_v16, %v2098_v17 }
 0xb8b   : > { %v2131_v34 = vmul.f32 %v2797_v51, %v2099_v41 }
 0xb8c   : > { %2153 = vst.msk [vmem:[%s3133_s27] sm:$0xff] %vm842_vm1, %v2149_v54  ;;  %v2140_v61 = vmul.f32 %v2418_v48, %v2130_v32 }
 0xb8d   : > { %v2799_v8 = vpop.eup %2798  ;;  %v2141_v37 = vmul.f32 %v2418_v48, %v2131_v34 }
 0xb8e   : > { %v2150_v38 = vadd.f32 %v2419_v14, %v2140_v61  ;;  %v2132_v40 = vmul.f32 %v2799_v8, %v2100_v18 }
 0xb8f   : > { %v2151_v4 = vadd.f32 %v2419_v14, %v2141_v37 }
 0xb90   : > { %2154 = vst.msk [vmem:[%s3133_s27 + $0x8] sm:$0xff] %vm842_vm1, %v2150_v38  ;;  %v2142_v5 = vmul.f32 %v2418_v48, %v2132_v40 }
 0xb91   : > { %2155 = vst.msk [vmem:[%s3133_s27 + $0x10] sm:$0xff] %vm842_vm1, %v2151_v4 }
 0xb92   : > { %v2152_v9 = vadd.f32 %v2419_v14, %v2142_v5 }
 0xb94   : > { %2156 = vst.msk [vmem:[%s3133_s27 + $0x18] sm:$0xff] %vm842_vm1, %v2152_v9 }
 0xb95 PF: > { %s3899_s23 = sld [smem:[#allocation10_spill]]  ;;  %s2171_s26 = sshll.u32 %s3133_s27, 4  ;;  %s3760_s26 = int_to_ptr.vmem [resolvable:$true] %s2171_s26 }
 0xb96   : > { %s3900_s21 = sld [smem:[#allocation7_spill]]  ;;  %s2800_s9 = scalar_lea.vmem %s3760_s26, 512 }
 0xb97   : > { %s3902_s28 = sld [smem:[#allocation30_spill]]  ;;  %p2801_p2 = scmp.ne.s32.totalorder %s3760_s26, %s2800_s9 }
 0xb98   : > { %s2897_s30 = smov [#allocation3]  }
 0xb99   : > { %p2802_p4 = pnand %p2801_p2, %p3044_p3  ;;  %s2804_s25 = sshll.u32 %s2897_s30, 4  ;;  %s2805_s25 = int_to_ptr.vmem [resolvable:$false] %s2804_s25 }
 0xb9a   : > { %s2806_s15 = scalar_lea.vmem %s2805_s25, 1024  ;;  %p2807_p6 = scmp.lt.s32.totalorder %s3760_s26, %s2805_s25 }
 0xb9b   : > { %s2431_s0 = sshll.u32 %s3899_s23, 9  ;;  %p2803_p5 = pneg %p2802_p4 }
 0xb9c   : > { %s3904_s8 = sand.u32 1, %s3900_s21   ;;  %p2808_p7 = scmp.lt.s32.totalorder %s2806_s15, %s2800_s9 }
 0xb9d   : > { %s3903_s24 = smov %s3902_s28  ;;  %s3757_s17 = scalar_lea.hbm %s3902_s28, %s2431_s0 }
 0xb9e   : > { %s3764_s6 = scalar_lea.sflag [#allocation4], %s3904_s8  ;;  %p2809_p8 = por %p2808_p7, %p2807_p6 }
 0xba0   : > { %p2810_p10 = pnand %p2809_p8, %p2803_p5 }
 0xba2   : > { %2813 = shalt.err (!%p2810_p10)
}
 0xba3   : > { %s2814_s27 = scalar_lea.hbm %s3757_s17, 512  ;;  %s2818_s16 = scalar_lea.hbm %s3903_s24, 1024 }
 0xba4   : > { %p2815_p11 = scmp.ne.s32.totalorder %s3757_s17, %s2814_s27  ;;  %p2819_p0 = scmp.lt.s32.totalorder %s3757_s17, %s3903_s24 }
 0xba5   : > { %p2820_p1 = scmp.lt.s32.totalorder %s2818_s16, %s2814_s27 }
 0xba6   : > { %p2816_p12 = pnand %p2815_p11, %p3044_p3 }
 0xba7   : > { %p2821_p2 = por %p2820_p1, %p2819_p0 }
 0xba8   : > { %p2817_p13 = pneg %p2816_p12 }
 0xbaa   : > { %p2822_p4 = pnand %p2821_p2, %p2817_p13 }
 0xbac   : > { %2825 = shalt.err (!%p2822_p4)
}
 0xbad   : > { %s2898_s23 = smov 128   ;;  %s2899_s21 = smov 8  }
 0xbae   : > { %2624 = dma.vmem_to_hbm [thread:$0]  (%p3044_p3), %s3760_s26, 512, %s3757_s17, %s3764_s6, %s2898_s23, %s2898_s23, %s2899_s21  }
 0xbaf PF: > { %s3905_s0 = sld [smem:[#allocation13_spill]] }
 0xbb0   : > { %s3906_s22 = sld [smem:[#allocation6_spill]] }
 0xbb5   : > { %p2630_p5 = scmp.ge.s32.totalorder %s3905_s0, 2 }
 0xbb6   : > { %s2186_s28 = sand.u32 1, %s3906_s22  }
 0xbb7   : > { %p2627_p6 = pnand %p2630_p5, %p3054_p9  ;;  %s2187_s8 = scalar_lea.sflag [#allocation4], %s2186_s28 }
 0xbb9   : > { %p2628_p7 = pneg %p2627_p6 }
 0xbbb   : > { %2859 = dma.done.wait (%p2628_p7), %s2187_s8, 512  }
 0xbbc   : > { %2861 = vsyncadd (%p2628_p7), %s2187_s8, 4294966784  ;;  %s31_s20 = sadd.s32 1, %s3905_s0   ;;  %s3908_s27 = sld [smem:[#allocation7_spill]] }
 0xbbd   : > { %p28_p8 = scmp.ge.s32.totalorder %s31_s20, 6   ;;  %s3909_s28 = sld [smem:[#allocation8_spill]] }
 0xbbe   : > { %s3910_s29 = sld [smem:[#allocation18_spill]] }
 0xbbf   : > { %s3911_s30 = sld [smem:[#allocation11_spill]]  ;;  %30 = sbr.rel (!%p28_p8) target bundleno = 18 (0x12), region = 174 }
 0xbc0   : > { %s3912_s0 = sld [smem:[#allocation12_spill]] }
 0xbc1   : > { %s3913_s19 = sld [smem:[#allocation14_spill]] }
 0xbc2   : > { %s3914_s1 = sld [smem:[#allocation16_spill]] }
 0xbc4   :  { %2192 = vsyncpa [#allocation4], 1 }
 0xbc5   :  { %2194 = vsyncpa [#allocation4 + $0x1], 1 }

</bundles_post_ra>
